<compile_context>
chip_gen: v5e
topology: v5e:2x2
jax: 0.10.0
libtpu: 0.0.40
codegen_flags: <defaults>
</compile_context>

<pallas_src>
import numpy as np
import jax
import jax.numpy as jnp
from jax import lax
from jax.experimental import pallas as pl
from jax.experimental.pallas import tpu as pltpu


_VMEM_SPEC = pl.BlockSpec(memory_space=pltpu.MemorySpace.VMEM)


# ----------------------------- Pallas kernels -------------------------------

def _make_fused_lstm_kernel(num_layers, seq_len, batch):
    """Fused multilayer LSTM over the full sequence (time-major, flattened rows).

    Ref layout (all 2-D row-major, rows = t*B + b):
      len_ref : (B, 1) int32       sequence lengths
      x_ref   : (T*B, E)           embedded input
      per layer: w_ih (Fin, 4H), w_hh (H, 4H), b (1, 4H)   gate order [i, f, g, o]
      y_ref   : (T*B, H)           last layer output (zeros at padded steps)
      h_out   : (L, B, H)          state at last valid timestep per sequence/layer
      scratch : pre-gates (T*B, 4H), 2x activation ping-pong (T*B, H), h (B,H), c (B,H)
    """
    L, T, B = num_layers, seq_len, batch

    def kernel(*refs):
        len_ref, x_ref = refs[0], refs[1]
        w_refs = refs[2:2 + 3 * L]
        y_ref, h_out_ref, pg_scr, act_a, act_b, h_scr, c_scr = refs[2 + 3 * L:]
        H = h_scr.shape[1]
        lens = len_ref[...]                                   # (B, 1) int32
        acts = (act_a, act_b)

        def run_layer(src_ref, dst_ref, wih_ref, whh_ref, b_ref, layer_idx):
            # (1) Hoisted input projection: one big MXU GEMM over all timesteps,
            #     bias broadcast happens once per layer (not per step).
            pg_scr[...] = (jnp.dot(src_ref[...], wih_ref[...],
                                   preferred_element_type=jnp.float32)
                           + b_ref[...])
            h_scr[...] = jnp.zeros_like(h_scr)
            c_scr[...] = jnp.zeros_like(c_scr)

            def step(t, carry):
                r0 = t * B
                if B % 8 == 0:
                    r0 = pl.multiple_of(r0, 8)                # aligned sublane slice
                h_prev = h_scr[...]
                c_prev = c_scr[...]
                # (2) Only the recurrent h @ W_hh matmul stays in the time loop.
                gates = pg_scr[pl.ds(r0, B), :] + jnp.dot(
                    h_prev, whh_ref[...], preferred_element_type=jnp.float32)
                i = jax.nn.sigmoid(gates[:, 0 * H:1 * H])     # lane-aligned slices
                f = jax.nn.sigmoid(gates[:, 1 * H:2 * H])
                g = jnp.tanh(gates[:, 2 * H:3 * H])
                o = jax.nn.sigmoid(gates[:, 3 * H:4 * H])
                c_new = f * c_prev + i * g
                h_new = o * jnp.tanh(c_new)
                valid = t < lens                              # packed-seq mask (B, 1)
                h_scr[...] = jnp.where(valid, h_new, h_prev)
                c_scr[...] = jnp.where(valid, c_new, c_prev)
                dst_ref[pl.ds(r0, B), :] = jnp.where(valid, h_new, 0.0)
                return carry

            lax.fori_loop(0, T, step, 0)
            h_out_ref[layer_idx] = h_scr[...]

        # (3) All layers fused in one kernel; intermediate activations stay in VMEM.
        src = x_ref
        for l in range(L):
            dst = y_ref if l == L - 1 else acts[l % 2]
            wih_ref, whh_ref, b_ref = (w_refs[3 * l], w_refs[3 * l + 1],
                                       w_refs[3 * l + 2])
            run_layer(src, dst, wih_ref, whh_ref, b_ref, l)
            src = dst

    return kernel


def _linear_softmax_kernel(x_ref, w_ref, b_ref, o_ref):
    """o = softmax(x @ w + b, axis=-1) on one row tile.  x:(tn,H) w:(H,V) b:(1,V)."""
    logits = (jnp.dot(x_ref[...], w_ref[...], preferred_element_type=jnp.float32)
              + b_ref[...])
    m = jnp.max(logits, axis=-1, keepdims=True)
    e = jnp.exp(logits - m)
    s = jnp.sum(e, axis=-1, keepdims=True)
    # divide goes to the EUP slot instead of occupying VALU slots
    o_ref[...] = (e * pl.reciprocal(s, approx=True)).astype(o_ref.dtype)


# ------------------------------- Wrappers ------------------------------------

def _round_up(x, m):
    return ((x + m - 1) // m) * m


def fused_lstm_pallas(x2d, lens_b1, layers, T, B):
    TB, E = x2d.shape
    H = layers[0]["w_hh"].shape[0]
    L = len(layers)
    wargs = []
    for lyr in layers:
        wargs += [lyr["w_ih"], lyr["w_hh"], lyr["b"]]

    scratch = [
        pltpu.VMEM((TB, 4 * H), jnp.float32),   # hoisted pre-gates, all timesteps
        pltpu.VMEM((TB, H), jnp.float32),       # activation ping
        pltpu.VMEM((TB, H), jnp.float32),       # activation pong
        pltpu.VMEM((B, H), jnp.float32),        # h state
        pltpu.VMEM((B, H), jnp.float32),        # c state
    ]

    # VMEM budget sized from actual buffer usage (x2 margin, floor 32 MiB).
    nbytes = 4 * (TB * E + B                                    # x, lens
                  + TB * H + L * B * H                          # outputs
                  + TB * 4 * H + 2 * TB * H + 2 * B * H)        # scratch
    for lyr in layers:
        nbytes += 4 * (lyr["w_ih"].size + lyr["w_hh"].size + lyr["b"].size)
    vmem_limit = int(min(128 << 20, max(32 << 20, 2 * nbytes)))

    y2d, h_all = pl.pallas_call(
        _make_fused_lstm_kernel(L, T, B),
        out_shape=(jax.ShapeDtypeStruct((TB, H), jnp.float32),
                   jax.ShapeDtypeStruct((L, B, H), jnp.float32)),
        in_specs=[_VMEM_SPEC] * (2 + 3 * L),
        out_specs=(_VMEM_SPEC, _VMEM_SPEC),
        scratch_shapes=scratch,
        compiler_params=pltpu.CompilerParams(vmem_limit_bytes=vmem_limit),
    )(lens_b1, x2d, *wargs)
    return y2d, h_all


def linear_softmax_pallas(x2d, w, b, tile_n=256):
    """Row-tiled (pipelined) linear + softmax: softmax(x @ w + b, -1)."""
    N, H = x2d.shape
    V = w.shape[1]
    tn = int(min(tile_n, _round_up(N, 8)))
    n_pad = _round_up(N, tn)
    if n_pad != N:
        x2d = jnp.pad(x2d, ((0, n_pad - N), (0, 0)))
    grid = (n_pad // tn,)

    # double-buffered x/out tiles + resident weights, x2 margin, floor 32 MiB
    per_step = 4 * (2 * tn * H + H * V + 2 * V + 2 * tn * V)
    vmem_limit = int(min(128 << 20, max(32 << 20, 2 * per_step)))

    out = pl.pallas_call(
        _linear_softmax_kernel,
        out_shape=jax.ShapeDtypeStruct((n_pad, V), jnp.float32),
        grid=grid,
        in_specs=[pl.BlockSpec((tn, H), lambda i: (i, 0)),
                  pl.BlockSpec((H, V), lambda i: (0, 0)),
                  pl.BlockSpec((1, V), lambda i: (0, 0))],
        out_specs=pl.BlockSpec((tn, V), lambda i: (i, 0)),
        compiler_params=pltpu.CompilerParams(
            dimension_semantics=("parallel",),      # shard row tiles across v7x cores
            vmem_limit_bytes=vmem_limit),
    )(x2d, w, b)
    return out[:N]


def rnnlm_forward_pallas(params, tokens, lengths, t_out):
    """Returns (final_output (B, t_out, V), h (L, B, H)) — matches RNNLM.forward."""
    B, T = tokens.shape
    # Embedding gather directly in time-major order (no activation transpose).
    emb_tm = jnp.take(params["embed"], tokens.T, axis=0)        # (T, B, E)
    x2d = emb_tm.reshape(T * B, -1)                             # rows = t*B + b
    lens_b1 = lengths.astype(jnp.int32).reshape(-1, 1)

    y2d, h = fused_lstm_pallas(x2d, lens_b1, params["lstm"], T, B)
    H = y2d.shape[-1]
    # Single small (T,B,H)->(B,T,H) relayout (cheaper than transposing V-wide probs),
    # then pad_packed_sequence semantics via the :t_out slice.
    y = jnp.transpose(y2d.reshape(T, B, H), (1, 0, 2))[:, :t_out, :]
    probs = linear_softmax_pallas(y.reshape(B * t_out, H),
                                  params["lin_w"], params["lin_b"])
    return probs.reshape(B, t_out, -1), h


# --------------------------- Pure-JAX reference ------------------------------

def rnnlm_forward_ref(params, tokens, lengths, t_out):
    emb = jnp.take(params["embed"], tokens, axis=0)
    B, T, _ = emb.shape
    lens = lengths.astype(jnp.int32)
    x = emb
    h_finals = []
    for layer in params["lstm"]:
        H = layer["w_hh"].shape[0]
        w_ih, w_hh, b = layer["w_ih"], layer["w_hh"], layer["b"]

        def cell(carry, inp, w_ih=w_ih, w_hh=w_hh, b=b, H=H):
            h, c = carry
            x_t, t = inp
            gates = x_t @ w_ih + h @ w_hh + b
            i = jax.nn.sigmoid(gates[:, :H])
            f = jax.nn.sigmoid(gates[:, H:2 * H])
            g = jnp.tanh(gates[:, 2 * H:3 * H])
            o = jax.nn.sigmoid(gates[:, 3 * H:])
            c_new = f * c + i * g
            h_new = o * jnp.tanh(c_new)
            valid = (t < lens)[:, None]
            return ((jnp.where(valid, h_new, h), jnp.where(valid, c_new, c)),
                    jnp.where(valid, h_new, 0.0))

        (hN, _), ys = lax.scan(cell,
                               (jnp.zeros((B, H), jnp.float32),
                                jnp.zeros((B, H), jnp.float32)),
                               (jnp.transpose(x, (1, 0, 2)),
                                jnp.arange(T, dtype=jnp.int32)))
        x = jnp.transpose(ys, (1, 0, 2))
        h_finals.append(hN)
    h = jnp.stack(h_finals, axis=0)
    out = x[:, :t_out, :]
    logits = out @ params["lin_w"] + params["lin_b"]
    return jax.nn.softmax(logits, axis=-1), h


# --------------------------------- Main ---------------------------------------

def init_params(key, vocab_size, embed_size, hidden_size, num_layers):
    ks = list(jax.random.split(key, 2 + 4 * num_layers))
    params = {}
    params["embed"] = jax.random.uniform(ks[0], (vocab_size, embed_size),
                                         jnp.float32, -0.1, 0.1)
    params["lin_w"] = jax.random.uniform(ks[1], (hidden_size, vocab_size),
                                         jnp.float32, -0.1, 0.1)
    params["lin_b"] = jnp.zeros((1, vocab_size), jnp.float32)
    bound = 1.0 / np.sqrt(hidden_size)
    layers = []
    for l in range(num_layers):
        in_sz = embed_size if l == 0 else hidden_size
        k0, k1, k2, k3 = ks[2 + 4 * l: 2 + 4 * (l + 1)]
        w_ih = jax.random.uniform(k0, (in_sz, 4 * hidden_size), jnp.float32, -bound, bound)
        w_hh = jax.random.uniform(k1, (hidden_size, 4 * hidden_size), jnp.float32, -bound, bound)
        b_ih = jax.random.uniform(k2, (1, 4 * hidden_size), jnp.float32, -bound, bound)
        b_hh = jax.random.uniform(k3, (1, 4 * hidden_size), jnp.float32, -bound, bound)
        layers.append({"w_ih": w_ih, "w_hh": w_hh, "b": b_ih + b_hh})
    params["lstm"] = layers
    return params


if __name__ == "__main__":
    # Lane/sublane-aligned small shapes: B multiple of 8, H/E multiples of 128.
    B, T = 8, 8
    embed_size, hidden_size, num_layers, vocab_size = 128, 128, 2, 256

    key = jax.random.PRNGKey(0)
    k_param, k_tok = jax.random.split(key)
    params = init_params(k_param, vocab_size, embed_size, hidden_size, num_layers)

    tokens = jax.random.randint(k_tok, (B, T), 0, vocab_size, dtype=jnp.int32)
    lengths_np = np.array([8, 5, 3, 8, 6, 2, 7, 8], dtype=np.int32)
    lengths = jnp.asarray(lengths_np)
    t_out = int(lengths_np.max())            # pad_packed_sequence output length

    probs, h = rnnlm_forward_pallas(params, tokens, lengths, t_out)
    jax.block_until_ready((probs, h))

    probs_ref, h_ref = rnnlm_forward_ref(params, tokens, lengths, t_out)
    np.testing.assert_allclose(np.asarray(h), np.asarray(h_ref), rtol=1e-4, atol=1e-4)
    # approx reciprocal in the softmax only perturbs low-order bits -> slightly looser tol
    np.testing.assert_allclose(np.asarray(probs), np.asarray(probs_ref), rtol=5e-3, atol=1e-5)
    # rows of the softmax output must sum to ~1
    np.testing.assert_allclose(np.asarray(probs).sum(-1), 1.0, rtol=0, atol=5e-3)

    print("KERNEL_OK")
</pallas_src>

<mosaic_0001>
module attributes {stable_mosaic.version = 11 : i64} {
  func.func @kernel(%arg0: memref<8x1xi32, #tpu.memory_space<vmem>>, %arg1: memref<64x128xf32, #tpu.memory_space<vmem>>, %arg2: memref<128x512xf32, #tpu.memory_space<vmem>>, %arg3: memref<128x512xf32, #tpu.memory_space<vmem>>, %arg4: memref<1x512xf32, #tpu.memory_space<vmem>>, %arg5: memref<128x512xf32, #tpu.memory_space<vmem>>, %arg6: memref<128x512xf32, #tpu.memory_space<vmem>>, %arg7: memref<1x512xf32, #tpu.memory_space<vmem>>, %arg8: memref<64x128xf32, #tpu.memory_space<vmem>>, %arg9: memref<2x8x128xf32, #tpu.memory_space<vmem>>, %arg10: memref<64x512xf32, #tpu.memory_space<vmem>>, %arg11: memref<64x128xf32, #tpu.memory_space<vmem>>, %arg12: memref<64x128xf32, #tpu.memory_space<vmem>>, %arg13: memref<8x128xf32, #tpu.memory_space<vmem>>, %arg14: memref<8x128xf32, #tpu.memory_space<vmem>>) attributes {dimension_semantics = [], scalar_prefetch = 0 : i64, scratch_operands = 5 : i64, tpu.core_type = #tpu.core_type<tc>} {
    %c0 = arith.constant 0 : index
    %c0_0 = arith.constant 0 : index
    %0 = vector.load %arg0[%c0, %c0_0] : memref<8x1xi32, #tpu.memory_space<vmem>>, vector<8x1xi32>
    %c0_1 = arith.constant 0 : index
    %c0_2 = arith.constant 0 : index
    %1 = vector.load %arg1[%c0_1, %c0_2] : memref<64x128xf32, #tpu.memory_space<vmem>>, vector<64x128xf32>
    %c0_3 = arith.constant 0 : index
    %c0_4 = arith.constant 0 : index
    %2 = vector.load %arg2[%c0_3, %c0_4] : memref<128x512xf32, #tpu.memory_space<vmem>>, vector<128x512xf32>
    %cst = arith.constant dense<0.000000e+00> : vector<64x512xf32>
    %3 = tpu.matmul %1, %2, %cst {dimension_numbers = #tpu.dot_dimension_numbers<[1], [0], [0], [1], [0, 0, 1, 1], [], []>} : vector<64x128xf32>, vector<128x512xf32>, vector<64x512xf32> -> vector<64x512xf32>
    %c0_5 = arith.constant 0 : index
    %c0_6 = arith.constant 0 : index
    %4 = vector.load %arg4[%c0_5, %c0_6] : memref<1x512xf32, #tpu.memory_space<vmem>>, vector<1x512xf32>
    %5 = vector.broadcast %4 : vector<1x512xf32> to vector<64x512xf32>
    %6 = arith.addf %3, %5 : vector<64x512xf32>
    %c0_7 = arith.constant 0 : index
    %c0_8 = arith.constant 0 : index
    %7 = vector.load %arg10[%c0_7, %c0_8] : memref<64x512xf32, #tpu.memory_space<vmem>>, vector<64x512xf32>
    tpu.vector_store %arg10[%c0_7, %c0_8], %6 {strides = array<i32>} : memref<64x512xf32, #tpu.memory_space<vmem>>, vector<64x512xf32>,
    %cst_9 = arith.constant 0.000000e+00 : f32
    %8 = vector.broadcast %cst_9 : f32 to vector<8x128xf32>
    %c0_10 = arith.constant 0 : index
    %c0_11 = arith.constant 0 : index
    %9 = vector.load %arg13[%c0_10, %c0_11] : memref<8x128xf32, #tpu.memory_space<vmem>>, vector<8x128xf32>
    tpu.vector_store %arg13[%c0_10, %c0_11], %8 {strides = array<i32>} : memref<8x128xf32, #tpu.memory_space<vmem>>, vector<8x128xf32>,
    %cst_12 = arith.constant 0.000000e+00 : f32
    %10 = vector.broadcast %cst_12 : f32 to vector<8x128xf32>
    %c0_13 = arith.constant 0 : index
    %c0_14 = arith.constant 0 : index
    %11 = vector.load %arg14[%c0_13, %c0_14] : memref<8x128xf32, #tpu.memory_space<vmem>>, vector<8x128xf32>
    tpu.vector_store %arg14[%c0_13, %c0_14], %10 {strides = array<i32>} : memref<8x128xf32, #tpu.memory_space<vmem>>, vector<8x128xf32>,
    %c0_i32 = arith.constant 0 : i32
    %c8_i32 = arith.constant 8 : i32
    %12 = arith.addi %c0_i32, %c8_i32 : i32
    %c1_i32 = arith.constant 1 : i32
    scf.for %arg15 = %c0_i32 to %12 step %c1_i32  : i32 {
      %c8_i32_44 = arith.constant 8 : i32
      %33 = arith.muli %arg15, %c8_i32_44 : i32
      %34 = tpu.assume_multiple %33, 8 : i32
      %c0_45 = arith.constant 0 : index
      %c0_46 = arith.constant 0 : index
      %35 = vector.load %arg13[%c0_45, %c0_46] : memref<8x128xf32, #tpu.memory_space<vmem>>, vector<8x128xf32>
      %c0_47 = arith.constant 0 : index
      %c0_48 = arith.constant 0 : index
      %36 = vector.load %arg14[%c0_47, %c0_48] : memref<8x128xf32, #tpu.memory_space<vmem>>, vector<8x128xf32>
      %37 = arith.index_cast %34 : i32 to index
      %c0_49 = arith.constant 0 : index
      %38 = vector.load %arg10[%37, %c0_49] : memref<64x512xf32, #tpu.memory_space<vmem>>, vector<8x512xf32>
      %c0_50 = arith.constant 0 : index
      %c0_51 = arith.constant 0 : index
      %39 = vector.load %arg3[%c0_50, %c0_51] : memref<128x512xf32, #tpu.memory_space<vmem>>, vector<128x512xf32>
      %cst_52 = arith.constant dense<0.000000e+00> : vector<8x512xf32>
      %40 = tpu.matmul %35, %39, %cst_52 {dimension_numbers = #tpu.dot_dimension_numbers<[1], [0], [0], [1], [0, 0, 1, 1], [], []>} : vector<8x128xf32>, vector<128x512xf32>, vector<8x512xf32> -> vector<8x512xf32>
      %41 = arith.addf %38, %40 : vector<8x512xf32>
      %42 = vector.extract_strided_slice %41 {offsets = [0, 0], sizes = [8, 128], strides = [1, 1]} : vector<8x512xf32> to vector<8x128xf32>
      %43 = arith.negf %42 : vector<8x128xf32>
      %44 = math.exp %43 : vector<8x128xf32>
      %cst_53 = arith.constant 1.000000e+00 : f32
      %45 = vector.broadcast %cst_53 : f32 to vector<8x128xf32>
      %46 = arith.addf %45, %44 : vector<8x128xf32>
      %47 = arith.divf %45, %46 : vector<8x128xf32>
      %48 = vector.extract_strided_slice %41 {offsets = [0, 128], sizes = [8, 128], strides = [1, 1]} : vector<8x512xf32> to vector<8x128xf32>
      %49 = arith.negf %48 : vector<8x128xf32>
      %50 = math.exp %49 : vector<8x128xf32>
      %cst_54 = arith.constant 1.000000e+00 : f32
      %51 = vector.broadcast %cst_54 : f32 to vector<8x128xf32>
      %52 = arith.addf %51, %50 : vector<8x128xf32>
      %53 = arith.divf %51, %52 : vector<8x128xf32>
      %54 = vector.extract_strided_slice %41 {offsets = [0, 256], sizes = [8, 128], strides = [1, 1]} : vector<8x512xf32> to vector<8x128xf32>
      %55 = math.tanh %54 : vector<8x128xf32>
      %56 = vector.extract_strided_slice %41 {offsets = [0, 384], sizes = [8, 128], strides = [1, 1]} : vector<8x512xf32> to vector<8x128xf32>
      %57 = arith.negf %56 : vector<8x128xf32>
      %58 = math.exp %57 : vector<8x128xf32>
      %cst_55 = arith.constant 1.000000e+00 : f32
      %59 = vector.broadcast %cst_55 : f32 to vector<8x128xf32>
      %60 = arith.addf %59, %58 : vector<8x128xf32>
      %61 = arith.divf %59, %60 : vector<8x128xf32>
      %62 = arith.mulf %53, %36 : vector<8x128xf32>
      %63 = arith.mulf %47, %55 : vector<8x128xf32>
      %64 = arith.addf %62, %63 : vector<8x128xf32>
      %65 = math.tanh %64 : vector<8x128xf32>
      %66 = arith.mulf %61, %65 : vector<8x128xf32>
      %67 = vector.broadcast %arg15 : i32 to vector<8x1xi32>
      %68 = arith.cmpi slt, %67, %0 : vector<8x1xi32>
      %69 = vector.shape_cast %68 : vector<8x1xi1> to vector<8x1xi1>
      %70 = vector.broadcast %69 : vector<8x1xi1> to vector<8x128xi1>
      %71 = arith.select %70, %66, %35 : vector<8x128xi1>, vector<8x128xf32>
      %c0_56 = arith.constant 0 : index
      %c0_57 = arith.constant 0 : index
      %72 = vector.load %arg13[%c0_56, %c0_57] : memref<8x128xf32, #tpu.memory_space<vmem>>, vector<8x128xf32>
      tpu.vector_store %arg13[%c0_56, %c0_57], %71 {strides = array<i32>} : memref<8x128xf32, #tpu.memory_space<vmem>>, vector<8x128xf32>,
      %73 = vector.shape_cast %68 : vector<8x1xi1> to vector<8x1xi1>
      %74 = vector.broadcast %73 : vector<8x1xi1> to vector<8x128xi1>
      %75 = arith.select %74, %64, %36 : vector<8x128xi1>, vector<8x128xf32>
      %c0_58 = arith.constant 0 : index
      %c0_59 = arith.constant 0 : index
      %76 = vector.load %arg14[%c0_58, %c0_59] : memref<8x128xf32, #tpu.memory_space<vmem>>, vector<8x128xf32>
      tpu.vector_store %arg14[%c0_58, %c0_59], %75 {strides = array<i32>} : memref<8x128xf32, #tpu.memory_space<vmem>>, vector<8x128xf32>,
      %cst_60 = arith.constant 0.000000e+00 : f32
      %77 = vector.shape_cast %68 : vector<8x1xi1> to vector<8x1xi1>
      %78 = vector.broadcast %77 : vector<8x1xi1> to vector<8x128xi1>
      %79 = vector.broadcast %cst_60 : f32 to vector<8x128xf32>
      %80 = arith.select %78, %66, %79 : vector<8x128xi1>, vector<8x128xf32>
      %81 = arith.index_cast %34 : i32 to index
      %c0_61 = arith.constant 0 : index
      %82 = vector.load %arg11[%81, %c0_61] : memref<64x128xf32, #tpu.memory_space<vmem>>, vector<8x128xf32>
      tpu.vector_store %arg11[%81, %c0_61], %80 {strides = array<i32>} : memref<64x128xf32, #tpu.memory_space<vmem>>, vector<8x128xf32>,
    }
    %c8_i32_15 = arith.constant 8 : i32
    %c0_16 = arith.constant 0 : index
    %c0_17 = arith.constant 0 : index
    %13 = vector.load %arg13[%c0_16, %c0_17] : memref<8x128xf32, #tpu.memory_space<vmem>>, vector<8x128xf32>
    %c0_18 = arith.constant 0 : index
    %c0_19 = arith.constant 0 : index
    %c0_20 = arith.constant 0 : index
    %14 = vector.load %arg9[%c0_18, %c0_19, %c0_20] : memref<2x8x128xf32, #tpu.memory_space<vmem>>, vector<1x8x128xf32>
    %15 = vector.shape_cast %14 : vector<1x8x128xf32> to vector<8x128xf32>
    %16 = vector.shape_cast %13 : vector<8x128xf32> to vector<1x8x128xf32>
    tpu.vector_store %arg9[%c0_18, %c0_19, %c0_20], %16 {strides = array<i32>} : memref<2x8x128xf32, #tpu.memory_space<vmem>>, vector<1x8x128xf32>,
    %c0_21 = arith.constant 0 : index
    %c0_22 = arith.constant 0 : index
    %17 = vector.load %arg11[%c0_21, %c0_22] : memref<64x128xf32, #tpu.memory_space<vmem>>, vector<64x128xf32>
    %c0_23 = arith.constant 0 : index
    %c0_24 = arith.constant 0 : index
    %18 = vector.load %arg5[%c0_23, %c0_24] : memref<128x512xf32, #tpu.memory_space<vmem>>, vector<128x512xf32>
    %cst_25 = arith.constant dense<0.000000e+00> : vector<64x512xf32>
    %19 = tpu.matmul %17, %18, %cst_25 {dimension_numbers = #tpu.dot_dimension_numbers<[1], [0], [0], [1], [0, 0, 1, 1], [], []>} : vector<64x128xf32>, vector<128x512xf32>, vector<64x512xf32> -> vector<64x512xf32>
    %c0_26 = arith.constant 0 : index
    %c0_27 = arith.constant 0 : index
    %20 = vector.load %arg7[%c0_26, %c0_27] : memref<1x512xf32, #tpu.memory_space<vmem>>, vector<1x512xf32>
    %21 = vector.broadcast %20 : vector<1x512xf32> to vector<64x512xf32>
    %22 = arith.addf %19, %21 : vector<64x512xf32>
    %c0_28 = arith.constant 0 : index
    %c0_29 = arith.constant 0 : index
    %23 = vector.load %arg10[%c0_28, %c0_29] : memref<64x512xf32, #tpu.memory_space<vmem>>, vector<64x512xf32>
    tpu.vector_store %arg10[%c0_28, %c0_29], %22 {strides = array<i32>} : memref<64x512xf32, #tpu.memory_space<vmem>>, vector<64x512xf32>,
    %cst_30 = arith.constant 0.000000e+00 : f32
    %24 = vector.broadcast %cst_30 : f32 to vector<8x128xf32>
    %c0_31 = arith.constant 0 : index
    %c0_32 = arith.constant 0 : index
    %25 = vector.load %arg13[%c0_31, %c0_32] : memref<8x128xf32, #tpu.memory_space<vmem>>, vector<8x128xf32>
    tpu.vector_store %arg13[%c0_31, %c0_32], %24 {strides = array<i32>} : memref<8x128xf32, #tpu.memory_space<vmem>>, vector<8x128xf32>,
    %cst_33 = arith.constant 0.000000e+00 : f32
    %26 = vector.broadcast %cst_33 : f32 to vector<8x128xf32>
    %c0_34 = arith.constant 0 : index
    %c0_35 = arith.constant 0 : index
    %27 = vector.load %arg14[%c0_34, %c0_35] : memref<8x128xf32, #tpu.memory_space<vmem>>, vector<8x128xf32>
    tpu.vector_store %arg14[%c0_34, %c0_35], %26 {strides = array<i32>} : memref<8x128xf32, #tpu.memory_space<vmem>>, vector<8x128xf32>,
    %c0_i32_36 = arith.constant 0 : i32
    %c8_i32_37 = arith.constant 8 : i32
    %28 = arith.addi %c0_i32_36, %c8_i32_37 : i32
    %c1_i32_38 = arith.constant 1 : i32
    scf.for %arg15 = %c0_i32_36 to %28 step %c1_i32_38  : i32 {
      %c8_i32_44 = arith.constant 8 : i32
      %33 = arith.muli %arg15, %c8_i32_44 : i32
      %34 = tpu.assume_multiple %33, 8 : i32
      %c0_45 = arith.constant 0 : index
      %c0_46 = arith.constant 0 : index
      %35 = vector.load %arg13[%c0_45, %c0_46] : memref<8x128xf32, #tpu.memory_space<vmem>>, vector<8x128xf32>
      %c0_47 = arith.constant 0 : index
      %c0_48 = arith.constant 0 : index
      %36 = vector.load %arg14[%c0_47, %c0_48] : memref<8x128xf32, #tpu.memory_space<vmem>>, vector<8x128xf32>
      %37 = arith.index_cast %34 : i32 to index
      %c0_49 = arith.constant 0 : index
      %38 = vector.load %arg10[%37, %c0_49] : memref<64x512xf32, #tpu.memory_space<vmem>>, vector<8x512xf32>
      %c0_50 = arith.constant 0 : index
      %c0_51 = arith.constant 0 : index
      %39 = vector.load %arg6[%c0_50, %c0_51] : memref<128x512xf32, #tpu.memory_space<vmem>>, vector<128x512xf32>
      %cst_52 = arith.constant dense<0.000000e+00> : vector<8x512xf32>
      %40 = tpu.matmul %35, %39, %cst_52 {dimension_numbers = #tpu.dot_dimension_numbers<[1], [0], [0], [1], [0, 0, 1, 1], [], []>} : vector<8x128xf32>, vector<128x512xf32>, vector<8x512xf32> -> vector<8x512xf32>
      %41 = arith.addf %38, %40 : vector<8x512xf32>
      %42 = vector.extract_strided_slice %41 {offsets = [0, 0], sizes = [8, 128], strides = [1, 1]} : vector<8x512xf32> to vector<8x128xf32>
      %43 = arith.negf %42 : vector<8x128xf32>
      %44 = math.exp %43 : vector<8x128xf32>
      %cst_53 = arith.constant 1.000000e+00 : f32
      %45 = vector.broadcast %cst_53 : f32 to vector<8x128xf32>
      %46 = arith.addf %45, %44 : vector<8x128xf32>
      %47 = arith.divf %45, %46 : vector<8x128xf32>
      %48 = vector.extract_strided_slice %41 {offsets = [0, 128], sizes = [8, 128], strides = [1, 1]} : vector<8x512xf32> to vector<8x128xf32>
      %49 = arith.negf %48 : vector<8x128xf32>
      %50 = math.exp %49 : vector<8x128xf32>
      %cst_54 = arith.constant 1.000000e+00 : f32
      %51 = vector.broadcast %cst_54 : f32 to vector<8x128xf32>
      %52 = arith.addf %51, %50 : vector<8x128xf32>
      %53 = arith.divf %51, %52 : vector<8x128xf32>
      %54 = vector.extract_strided_slice %41 {offsets = [0, 256], sizes = [8, 128], strides = [1, 1]} : vector<8x512xf32> to vector<8x128xf32>
      %55 = math.tanh %54 : vector<8x128xf32>
      %56 = vector.extract_strided_slice %41 {offsets = [0, 384], sizes = [8, 128], strides = [1, 1]} : vector<8x512xf32> to vector<8x128xf32>
      %57 = arith.negf %56 : vector<8x128xf32>
      %58 = math.exp %57 : vector<8x128xf32>
      %cst_55 = arith.constant 1.000000e+00 : f32
      %59 = vector.broadcast %cst_55 : f32 to vector<8x128xf32>
      %60 = arith.addf %59, %58 : vector<8x128xf32>
      %61 = arith.divf %59, %60 : vector<8x128xf32>
      %62 = arith.mulf %53, %36 : vector<8x128xf32>
      %63 = arith.mulf %47, %55 : vector<8x128xf32>
      %64 = arith.addf %62, %63 : vector<8x128xf32>
      %65 = math.tanh %64 : vector<8x128xf32>
      %66 = arith.mulf %61, %65 : vector<8x128xf32>
      %67 = vector.broadcast %arg15 : i32 to vector<8x1xi32>
      %68 = arith.cmpi slt, %67, %0 : vector<8x1xi32>
      %69 = vector.shape_cast %68 : vector<8x1xi1> to vector<8x1xi1>
      %70 = vector.broadcast %69 : vector<8x1xi1> to vector<8x128xi1>
      %71 = arith.select %70, %66, %35 : vector<8x128xi1>, vector<8x128xf32>
      %c0_56 = arith.constant 0 : index
      %c0_57 = arith.constant 0 : index
      %72 = vector.load %arg13[%c0_56, %c0_57] : memref<8x128xf32, #tpu.memory_space<vmem>>, vector<8x128xf32>
      tpu.vector_store %arg13[%c0_56, %c0_57], %71 {strides = array<i32>} : memref<8x128xf32, #tpu.memory_space<vmem>>, vector<8x128xf32>,
      %73 = vector.shape_cast %68 : vector<8x1xi1> to vector<8x1xi1>
      %74 = vector.broadcast %73 : vector<8x1xi1> to vector<8x128xi1>
      %75 = arith.select %74, %64, %36 : vector<8x128xi1>, vector<8x128xf32>
      %c0_58 = arith.constant 0 : index
      %c0_59 = arith.constant 0 : index
      %76 = vector.load %arg14[%c0_58, %c0_59] : memref<8x128xf32, #tpu.memory_space<vmem>>, vector<8x128xf32>
      tpu.vector_store %arg14[%c0_58, %c0_59], %75 {strides = array<i32>} : memref<8x128xf32, #tpu.memory_space<vmem>>, vector<8x128xf32>,
      %cst_60 = arith.constant 0.000000e+00 : f32
      %77 = vector.shape_cast %68 : vector<8x1xi1> to vector<8x1xi1>
      %78 = vector.broadcast %77 : vector<8x1xi1> to vector<8x128xi1>
      %79 = vector.broadcast %cst_60 : f32 to vector<8x128xf32>
      %80 = arith.select %78, %66, %79 : vector<8x128xi1>, vector<8x128xf32>
      %81 = arith.index_cast %34 : i32 to index
      %c0_61 = arith.constant 0 : index
      %82 = vector.load %arg8[%81, %c0_61] : memref<64x128xf32, #tpu.memory_space<vmem>>, vector<8x128xf32>
      tpu.vector_store %arg8[%81, %c0_61], %80 {strides = array<i32>} : memref<64x128xf32, #tpu.memory_space<vmem>>, vector<8x128xf32>,
    }
    %c8_i32_39 = arith.constant 8 : i32
    %c0_40 = arith.constant 0 : index
    %c0_41 = arith.constant 0 : index
    %29 = vector.load %arg13[%c0_40, %c0_41] : memref<8x128xf32, #tpu.memory_space<vmem>>, vector<8x128xf32>
    %c1 = arith.constant 1 : index
    %c0_42 = arith.constant 0 : index
    %c0_43 = arith.constant 0 : index
    %30 = vector.load %arg9[%c1, %c0_42, %c0_43] : memref<2x8x128xf32, #tpu.memory_space<vmem>>, vector<1x8x128xf32>
    %31 = vector.shape_cast %30 : vector<1x8x128xf32> to vector<8x128xf32>
    %32 = vector.shape_cast %29 : vector<8x128xf32> to vector<1x8x128xf32>
    tpu.vector_store %arg9[%c1, %c0_42, %c0_43], %32 {strides = array<i32>} : memref<2x8x128xf32, #tpu.memory_space<vmem>>, vector<1x8x128xf32>,
    return
  }
}

</mosaic_0001>

<bundles_post_ra>
// kernel: tpu_custom_call.1
= control target key start
LH: loop header
LB: loop body
LE: loop exit
PB: predicated region body
PF: predicated region fallthrough
CT: control target
= control target key end

     0   :  { %15 = vsyncpa [#allocation8], 0  ;;  %s1743_s0 = inlined_call_operand.vmem [shape: s32[8,1], index: 0, kind: input, shape index: {}]   ;;  %s1744_s1 = inlined_call_operand.hbm [shape: f32[64,128], index: 1, kind: input, shape index: {}]   ;;  %s1745_s2 = inlined_call_operand.hbm [shape: f32[128,512], index: 2, kind: input, shape index: {}]   ;;  %s1746_s3 = inlined_call_operand.hbm [shape: f32[128,512], index: 3, kind: input, shape index: {}]   ;;  %s1747_s4 = inlined_call_operand.vmem [shape: f32[1,512], index: 4, kind: input, shape index: {}]   ;;  %s1748_s5 = inlined_call_operand.hbm [shape: f32[128,512], index: 5, kind: input, shape index: {}]   ;;  %s1749_s6 = inlined_call_operand.hbm [shape: f32[128,512], index: 6, kind: input, shape index: {}]   ;;  %s1750_s7 = inlined_call_operand.vmem [shape: f32[1,512], index: 7, kind: input, shape index: {}]   ;;  %s1751_s8 = inlined_call_operand.hbm [shape: f32[64,128], index: 8, kind: output, shape index: {0}]   ;;  %s1752_s9 = inlined_call_operand.hbm [shape: f32[2,8,128], index: 9, kind: output, shape index: {1}]  }
   0x1   :  { %16 = vsyncpa [#allocation11], 0 }
   0x2   :  { %17 = vsyncpa [#allocation14], 0 }
   0x3   :  { %18 = vsyncpa [#allocation9], 0  ;;  %s39_s11 = sshll.u32 %s1745_s2, 4  ;;  %s40_s11 = int_to_ptr.hbm [resolvable:$true] %s39_s11 }
   0x4   :  { %19 = vsyncpa [#allocation18], 0  ;;  %s1492_s12 = smov [#allocation10]   ;;  %s67_s16 = sshll.u32 %s1748_s5, 4  ;;  %s68_s16 = int_to_ptr.hbm [resolvable:$true] %s67_s16 }
   0x5   :  { %s41_s13 = sshll.u32 %s1492_s12, 4  ;;  %s1493_s17 = smov 512   ;;  %s42_s13 = int_to_ptr.vmem [resolvable:$true] %s41_s13 }
   0x6   :  { %s1494_s18 = smov 32   ;;  %s1495_s19 = smov [#allocation13]  }
   0x7   :  { %47 = dma.hbm_to_vmem [thread:$0]  %s40_s11, 8192, %s42_s13, [#allocation11], %s1493_s17, %s1493_s17, %s1494_s18  }
   0x8   :  { %s69_s20 = sshll.u32 %s1495_s19, 4  ;;  %s26_s22 = sshll.u32 %s1744_s1, 4  ;;  %s70_s20 = int_to_ptr.vmem [resolvable:$true] %s69_s20  ;;  %s27_s22 = int_to_ptr.hbm [resolvable:$true] %s26_s22 }
   0x9   :  { %75 = dma.hbm_to_vmem [thread:$0]  %s68_s16, 8192, %s70_s20, [#allocation14], %s1493_s17, %s1493_s17, %s1494_s18  }
   0xa   :  { %s1496_s5 = smov [#allocation7]   ;;  %s52_s26 = sshll.u32 %s1746_s3, 4  ;;  %s53_s26 = int_to_ptr.hbm [resolvable:$true] %s52_s26 }
   0xb   :  { %s28_s23 = sshll.u32 %s1496_s5, 4  ;;  %s1497_s27 = smov 128   ;;  %s29_s23 = int_to_ptr.vmem [resolvable:$true] %s28_s23 }
   0xc   :  { %s1498_s28 = smov 8   ;;  %s1499_s1 = smov [#allocation12]  }
   0xd   :  { %34 = dma.hbm_to_vmem [thread:$0]  %s27_s22, 1024, %s29_s23, [#allocation8], %s1497_s27, %s1497_s27, %s1498_s28  }
   0xe   :  { %s54_s29 = sshll.u32 %s1499_s1, 4  ;;  %s80_s11 = sshll.u32 %s1749_s6, 4  ;;  %s55_s29 = int_to_ptr.vmem [resolvable:$true] %s54_s29  ;;  %s81_s11 = int_to_ptr.hbm [resolvable:$true] %s80_s11 }
   0xf   :  { %60 = dma.hbm_to_vmem [thread:$0]  %s53_s26, 8192, %s55_s29, [#allocation11], %s1493_s17, %s1493_s17, %s1494_s18  }
  0x10   :  { %s1500_s3 = smov [#allocation15]  }
  0x11   :  { %s82_s12 = sshll.u32 %s1500_s3, 4  ;;  %s83_s12 = int_to_ptr.vmem [resolvable:$true] %s82_s12 }
  0x12   :  { %88 = dma.hbm_to_vmem [thread:$0]  %s81_s11, 8192, %s83_s12, [#allocation14], %s1493_s17, %s1493_s17, %s1494_s18  }
  0x13   :  { %1474 = dma.done.wait [#allocation8], 1024  }
  0x14   :  { %1475 = vsyncadd [#allocation8], 4294966272 }
  0x15   :  { %1476 = dma.done.wait [#allocation11], 16384  }
  0x16   :  { %1477 = vsyncadd [#allocation11], 4294950912 }
  0x17   :  { %1478 = dma.done.wait [#allocation14], 16384  }
  0x18   :  { %1479 = vsyncadd [#allocation14], 4294950912  ;;  %v1501_v0 = vmov 0.0   ;;  %v1591_v1 = vld [vmem:[%s1743_s0] sm:$0xff]  ;;  %v183_v3 = vld [vmem:[#allocation10 + $0x1f8] sm:$0xff] }
  0x19   :  { %390 = vst [vmem:[#allocation5] sm:$0xff] %v1501_v0  ;;  %v182_v2 = vld [vmem:[#allocation10 + $0x1f0] sm:$0xff]  ;;  %317 = vmatpush.msra.mxu3 %v183_v3  ;;  %v179_v5 = vld [vmem:[#allocation10 + $0x1d8] sm:$0xff]  ;;  %v180_v8 = vld [vmem:[#allocation10 + $0x1e0] sm:$0xff] }
  0x1a   :  { %391 = vst [vmem:[#allocation6] sm:$0xff] %v1501_v0  ;;  %276 = vmatpush.msra.mxu2 %v182_v2  ;;  %v178_v4 = vld [vmem:[#allocation10 + $0x1d0] sm:$0xff]  ;;  %v175_v7 = vld [vmem:[#allocation10 + $0x1b8] sm:$0xff]  ;;  %v181_v9 = vld [vmem:[#allocation10 + $0x1e8] sm:$0xff]  ;;  %194 = vmatpush.msra.mxu0 %v180_v8 }
  0x1b   :  { %v174_v6 = vld [vmem:[#allocation10 + $0x1b0] sm:$0xff]  ;;  %318 = vmatpush.msra.mxu3 %v179_v5  ;;  %v176_v10 = vld [vmem:[#allocation10 + $0x1c0] sm:$0xff]  ;;  %235 = vmatpush.msra.mxu1 %v181_v9  ;;  %v171_v12 = vld [vmem:[#allocation10 + $0x198] sm:$0xff] }
  0x1c   :  { %277 = vmatpush.msra.mxu2 %v178_v4  ;;  %v170_v11 = vld [vmem:[#allocation10 + $0x190] sm:$0xff]  ;;  %v177_v13 = vld [vmem:[#allocation10 + $0x1c8] sm:$0xff]  ;;  %v172_v14 = vld [vmem:[#allocation10 + $0x1a0] sm:$0xff]  ;;  %195 = vmatpush.msra.mxu0 %v176_v10 }
  0x1d   :  { %319 = vmatpush.msra.mxu3 %v175_v7  ;;  %v173_v15 = vld [vmem:[#allocation10 + $0x1a8] sm:$0xff]  ;;  %236 = vmatpush.msra.mxu1 %v177_v13  ;;  %v166_v16 = vld [vmem:[#allocation10 + $0x170] sm:$0xff]  ;;  %v167_v17 = vld [vmem:[#allocation10 + $0x178] sm:$0xff] }
  0x1e   :  { %278 = vmatpush.msra.mxu2 %v174_v6  ;;  %v168_v18 = vld [vmem:[#allocation10 + $0x180] sm:$0xff]  ;;  %v169_v19 = vld [vmem:[#allocation10 + $0x188] sm:$0xff]  ;;  %196 = vmatpush.msra.mxu0 %v172_v14  ;;  %v162_v20 = vld [vmem:[#allocation10 + $0x150] sm:$0xff] }
  0x1f   :  { %320 = vmatpush.msra.mxu3 %v171_v12  ;;  %237 = vmatpush.msra.mxu1 %v173_v15  ;;  %v163_v21 = vld [vmem:[#allocation10 + $0x158] sm:$0xff]  ;;  %v164_v22 = vld [vmem:[#allocation10 + $0x160] sm:$0xff]  ;;  %v165_v23 = vld [vmem:[#allocation10 + $0x168] sm:$0xff] }
  0x20   :  { %279 = vmatpush.msra.mxu2 %v170_v11  ;;  %197 = vmatpush.msra.mxu0 %v168_v18  ;;  %v158_v24 = vld [vmem:[#allocation10 + $0x130] sm:$0xff]  ;;  %v159_v25 = vld [vmem:[#allocation10 + $0x138] sm:$0xff]  ;;  %v160_v26 = vld [vmem:[#allocation10 + $0x140] sm:$0xff] }
  0x21   :  { %321 = vmatpush.msra.mxu3 %v167_v17  ;;  %238 = vmatpush.msra.mxu1 %v169_v19  ;;  %v161_v27 = vld [vmem:[#allocation10 + $0x148] sm:$0xff]  ;;  %v154_v28 = vld [vmem:[#allocation10 + $0x110] sm:$0xff]  ;;  %v155_v29 = vld [vmem:[#allocation10 + $0x118] sm:$0xff] }
  0x22   :  { %280 = vmatpush.msra.mxu2 %v166_v16  ;;  %198 = vmatpush.msra.mxu0 %v164_v22  ;;  %v156_v30 = vld [vmem:[#allocation10 + $0x120] sm:$0xff]  ;;  %v157_v31 = vld [vmem:[#allocation10 + $0x128] sm:$0xff]  ;;  %v150_v32 = vld [vmem:[#allocation10 + $0xf0] sm:$0xff] }
  0x23   :  { %322 = vmatpush.msra.mxu3 %v163_v21  ;;  %239 = vmatpush.msra.mxu1 %v165_v23  ;;  %v151_v33 = vld [vmem:[#allocation10 + $0xf8] sm:$0xff]  ;;  %v152_v34 = vld [vmem:[#allocation10 + $0x100] sm:$0xff]  ;;  %v153_v35 = vld [vmem:[#allocation10 + $0x108] sm:$0xff] }
  0x24   :  { %281 = vmatpush.msra.mxu2 %v162_v20  ;;  %199 = vmatpush.msra.mxu0 %v160_v26  ;;  %v146_v36 = vld [vmem:[#allocation10 + $0xd0] sm:$0xff]  ;;  %v147_v37 = vld [vmem:[#allocation10 + $0xd8] sm:$0xff]  ;;  %v148_v38 = vld [vmem:[#allocation10 + $0xe0] sm:$0xff] }
  0x25   :  { %323 = vmatpush.msra.mxu3 %v159_v25  ;;  %240 = vmatpush.msra.mxu1 %v161_v27  ;;  %v149_v39 = vld [vmem:[#allocation10 + $0xe8] sm:$0xff]  ;;  %v142_v40 = vld [vmem:[#allocation10 + $0xb0] sm:$0xff]  ;;  %v143_v41 = vld [vmem:[#allocation10 + $0xb8] sm:$0xff] }
  0x26   :  { %282 = vmatpush.msra.mxu2 %v158_v24  ;;  %200 = vmatpush.msra.mxu0 %v156_v30  ;;  %v144_v42 = vld [vmem:[#allocation10 + $0xc0] sm:$0xff]  ;;  %v145_v43 = vld [vmem:[#allocation10 + $0xc8] sm:$0xff]  ;;  %v138_v44 = vld [vmem:[#allocation10 + $0x90] sm:$0xff] }
  0x27   :  { %324 = vmatpush.msra.mxu3 %v155_v29  ;;  %241 = vmatpush.msra.mxu1 %v157_v31  ;;  %v139_v45 = vld [vmem:[#allocation10 + $0x98] sm:$0xff]  ;;  %v140_v46 = vld [vmem:[#allocation10 + $0xa0] sm:$0xff]  ;;  %v141_v47 = vld [vmem:[#allocation10 + $0xa8] sm:$0xff] }
  0x28   :  { %283 = vmatpush.msra.mxu2 %v154_v28  ;;  %201 = vmatpush.msra.mxu0 %v152_v34  ;;  %v134_v48 = vld [vmem:[#allocation10 + $0x70] sm:$0xff]  ;;  %v135_v49 = vld [vmem:[#allocation10 + $0x78] sm:$0xff]  ;;  %v136_v50 = vld [vmem:[#allocation10 + $0x80] sm:$0xff] }
  0x29   :  { %325 = vmatpush.msra.mxu3 %v151_v33  ;;  %242 = vmatpush.msra.mxu1 %v153_v35  ;;  %v137_v51 = vld [vmem:[#allocation10 + $0x88] sm:$0xff]  ;;  %v130_v52 = vld [vmem:[#allocation10 + $0x50] sm:$0xff]  ;;  %v131_v53 = vld [vmem:[#allocation10 + $0x58] sm:$0xff] }
  0x2a   :  { %284 = vmatpush.msra.mxu2 %v150_v32  ;;  %202 = vmatpush.msra.mxu0 %v148_v38  ;;  %v132_v54 = vld [vmem:[#allocation10 + $0x60] sm:$0xff]  ;;  %v133_v55 = vld [vmem:[#allocation10 + $0x68] sm:$0xff]  ;;  %v126_v56 = vld [vmem:[#allocation10 + $0x30] sm:$0xff] }
  0x2b   :  { %326 = vmatpush.msra.mxu3 %v147_v37  ;;  %243 = vmatpush.msra.mxu1 %v149_v39  ;;  %v127_v57 = vld [vmem:[#allocation10 + $0x38] sm:$0xff]  ;;  %v128_v58 = vld [vmem:[#allocation10 + $0x40] sm:$0xff]  ;;  %v129_v59 = vld [vmem:[#allocation10 + $0x48] sm:$0xff] }
  0x2c   :  { %285 = vmatpush.msra.mxu2 %v146_v36  ;;  %203 = vmatpush.msra.mxu0 %v144_v42  ;;  %v122_v60 = vld [vmem:[#allocation10 + $0x10] sm:$0xff]  ;;  %v123_v61 = vld [vmem:[#allocation10 + $0x18] sm:$0xff]  ;;  %v112_v62 = vld [vmem:[#allocation7] sm:$0xff] }
  0x2d   :  { %327 = vmatpush.msra.mxu3 %v143_v41  ;;  %244 = vmatpush.msra.mxu1 %v145_v43  ;;  %v124_v63 = vld [vmem:[#allocation10 + $0x20] sm:$0xff]  ;;  %v125_v2 = vld [vmem:[#allocation10 + $0x28] sm:$0xff]  ;;  %v114_v6 = vld [vmem:[#allocation7 + $0x10] sm:$0xff] }
  0x2e   :  { %286 = vmatpush.msra.mxu2 %v142_v40  ;;  %204 = vmatpush.msra.mxu0 %v140_v46  ;;  %v120_v3 = vld [vmem:[#allocation10] sm:$0xff]  ;;  %v121_v4 = vld [vmem:[#allocation10 + $0x8] sm:$0xff]  ;;  %v115_v7 = vld [vmem:[#allocation7 + $0x18] sm:$0xff] }
  0x2f   :  { %328 = vmatpush.msra.mxu3 %v139_v45  ;;  %245 = vmatpush.msra.mxu1 %v141_v47  ;;  %v113_v5 = vld [vmem:[#allocation7 + $0x8] sm:$0xff]  ;;  %v116_v8 = vld [vmem:[#allocation7 + $0x20] sm:$0xff]  ;;  %v118_v10 = vld [vmem:[#allocation7 + $0x30] sm:$0xff] }
  0x30   :  { %287 = vmatpush.msra.mxu2 %v138_v44  ;;  %205 = vmatpush.msra.mxu0 %v136_v50  ;;  %v117_v9 = vld [vmem:[#allocation7 + $0x28] sm:$0xff]  ;;  %v119_v11 = vld [vmem:[#allocation7 + $0x38] sm:$0xff]  ;;  %v184_v12 = vld [vmem:[%s1747_s4] sm:$0xf]  ;;  %s1636_s4 = smov 0  }
  0x31   :  { %329 = vmatpush.msra.mxu3 %v135_v49  ;;  %246 = vmatpush.msra.mxu1 %v137_v51  ;;  %v1596_v13 = vperm.slane %v184_v12, 0  ;;  %v1598_v14 = vperm.slane %v184_v12, 1  ;;  %v1600_v15 = vperm.slane %v184_v12, 2  ;;  %v1602_v16 = vperm.slane %v184_v12, 3 }
  0x32   :  { %288 = vmatpush.msra.mxu2 %v134_v48  ;;  %206 = vmatpush.msra.mxu0 %v132_v54 }
  0x33   :  { %330 = vmatpush.msra.mxu3 %v131_v53  ;;  %247 = vmatpush.msra.mxu1 %v133_v55 }
  0x34   :  { %289 = vmatpush.msra.mxu2 %v130_v52  ;;  %207 = vmatpush.msra.mxu0 %v128_v58 }
  0x35   :  { %331 = vmatpush.msra.mxu3 %v127_v57  ;;  %248 = vmatpush.msra.mxu1 %v129_v59 }
  0x36   :  { %290 = vmatpush.msra.mxu2 %v126_v56  ;;  %208 = vmatpush.msra.mxu0 %v124_v63 }
  0x37   :  { %332 = vmatpush.msra.mxu3 %v123_v61  ;;  %249 = vmatpush.msra.mxu1 %v125_v2 }
  0x38   :  { %291 = vmatpush.msra.mxu2 %v122_v60  ;;  %333 = vmatmul.f32.vlgmr.msra.gmra.mxu3 %v112_v62 }
  0x39   :  { %292 = vmatmul.f32.vlgmr.msra.gmra.mxu2 %v112_v62  ;;  %209 = vmatpush.msra.mxu0 %v120_v3 }
  0x3a   :  { %250 = vmatpush.msra.mxu1 %v121_v4  ;;  %210 = vmatmul.f32.vlgmr.msra.gmra.mxu0 %v112_v62 }
  0x3b   :  { %251 = vmatmul.f32.vlgmr.msra.gmra.mxu1 %v112_v62 }
  0x40   :  { %336 = vmatmul.f32.gmra.mxu3 %v113_v5 }
  0x41   :  { %295 = vmatmul.f32.gmra.mxu2 %v113_v5 }
  0x42   :  { %213 = vmatmul.f32.gmra.mxu0 %v113_v5 }
  0x43   :  { %254 = vmatmul.f32.gmra.mxu1 %v113_v5 }
  0x48   :  { %339 = vmatmul.f32.gmra.mxu3 %v114_v6 }
  0x49   :  { %298 = vmatmul.f32.gmra.mxu2 %v114_v6 }
  0x4a   :  { %216 = vmatmul.f32.gmra.mxu0 %v114_v6 }
  0x4b   :  { %257 = vmatmul.f32.gmra.mxu1 %v114_v6 }
  0x50   :  { %342 = vmatmul.f32.gmra.mxu3 %v115_v7 }
  0x51   :  { %301 = vmatmul.f32.gmra.mxu2 %v115_v7 }
  0x52   :  { %219 = vmatmul.f32.gmra.mxu0 %v115_v7 }
  0x53   :  { %260 = vmatmul.f32.gmra.mxu1 %v115_v7 }
  0x58   :  { %345 = vmatmul.f32.gmra.mxu3 %v116_v8 }
  0x59   :  { %304 = vmatmul.f32.gmra.mxu2 %v116_v8 }
  0x5a   :  { %222 = vmatmul.f32.gmra.mxu0 %v116_v8 }
  0x5b   :  { %263 = vmatmul.f32.gmra.mxu1 %v116_v8 }
  0x60   :  { %348 = vmatmul.f32.gmra.mxu3 %v117_v9 }
  0x61   :  { %307 = vmatmul.f32.gmra.mxu2 %v117_v9 }
  0x62   :  { %225 = vmatmul.f32.gmra.mxu0 %v117_v9 }
  0x63   :  { %266 = vmatmul.f32.gmra.mxu1 %v117_v9 }
  0x68   :  { %351 = vmatmul.f32.gmra.mxu3 %v118_v10 }
  0x69   :  { %310 = vmatmul.f32.gmra.mxu2 %v118_v10 }
  0x6a   :  { %228 = vmatmul.f32.gmra.mxu0 %v118_v10 }
  0x6b   :  { %269 = vmatmul.f32.gmra.mxu1 %v118_v10 }
  0x70   :  { %354 = vmatmul.f32.gmra.mxu3 %v119_v11 }
  0x71   :  { %313 = vmatmul.f32.gmra.mxu2 %v119_v11 }
  0x72   :  { %231 = vmatmul.f32.gmra.mxu0 %v119_v11 }
  0x73   :  { %272 = vmatmul.f32.gmra.mxu1 %v119_v11 }
  0xb7   :  { %v211_v17 = vpop.f32.mrf.mxu0 }
  0xb8   :  { %v252_v18 = vpop.f32.mrf.mxu1  ;;  %v212_v19 = vadd.f32 %v211_v17, %v1596_v13 }
  0xb9   :  { %v253_v20 = vadd.f32 %v252_v18, %v1598_v14 }
  0xba   :  { %358 = vst [vmem:[#allocation2] sm:$0xff] %v212_v19 }
  0xbb   :  { %v334_v22 = vpop.f32.mrf.mxu3  ;;  %359 = vst [vmem:[#allocation2 + $0x8] sm:$0xff] %v253_v20 }
  0xbc   :  { %v293_v21 = vpop.f32.mrf.mxu2  ;;  %v335_v24 = vadd.f32 %v334_v22, %v1602_v16 }
  0xbd   :  { %v294_v23 = vadd.f32 %v293_v21, %v1600_v15 }
  0xbe   :  { %361 = vst [vmem:[#allocation2 + $0x18] sm:$0xff] %v335_v24 }
  0xbf   :  { %360 = vst [vmem:[#allocation2 + $0x10] sm:$0xff] %v294_v23  ;;  %v214_v25 = vpop.f32.mrf.mxu0 }
  0xc0   :  { %v255_v26 = vpop.f32.mrf.mxu1  ;;  %v215_v27 = vadd.f32 %v214_v25, %v1596_v13 }
  0xc1   :  { %v256_v28 = vadd.f32 %v255_v26, %v1598_v14 }
  0xc2   :  { %362 = vst [vmem:[#allocation2 + $0x20] sm:$0xff] %v215_v27 }
  0xc3   :  { %v337_v30 = vpop.f32.mrf.mxu3  ;;  %363 = vst [vmem:[#allocation2 + $0x28] sm:$0xff] %v256_v28 }
  0xc4   :  { %v296_v29 = vpop.f32.mrf.mxu2  ;;  %v338_v32 = vadd.f32 %v337_v30, %v1602_v16 }
  0xc5   :  { %v297_v31 = vadd.f32 %v296_v29, %v1600_v15 }
  0xc6   :  { %365 = vst [vmem:[#allocation2 + $0x38] sm:$0xff] %v338_v32 }
  0xc7   :  { %364 = vst [vmem:[#allocation2 + $0x30] sm:$0xff] %v297_v31  ;;  %v217_v33 = vpop.f32.mrf.mxu0 }
  0xc8   :  { %v258_v34 = vpop.f32.mrf.mxu1  ;;  %v218_v35 = vadd.f32 %v217_v33, %v1596_v13 }
  0xc9   :  { %v259_v36 = vadd.f32 %v258_v34, %v1598_v14 }
  0xca   :  { %366 = vst [vmem:[#allocation2 + $0x40] sm:$0xff] %v218_v35 }
  0xcb   :  { %v340_v38 = vpop.f32.mrf.mxu3  ;;  %367 = vst [vmem:[#allocation2 + $0x48] sm:$0xff] %v259_v36 }
  0xcc   :  { %v299_v37 = vpop.f32.mrf.mxu2  ;;  %v341_v40 = vadd.f32 %v340_v38, %v1602_v16 }
  0xcd   :  { %v300_v39 = vadd.f32 %v299_v37, %v1600_v15 }
  0xce   :  { %369 = vst [vmem:[#allocation2 + $0x58] sm:$0xff] %v341_v40 }
  0xcf   :  { %368 = vst [vmem:[#allocation2 + $0x50] sm:$0xff] %v300_v39  ;;  %v220_v41 = vpop.f32.mrf.mxu0 }
  0xd0   :  { %v261_v42 = vpop.f32.mrf.mxu1  ;;  %v221_v43 = vadd.f32 %v220_v41, %v1596_v13 }
  0xd1   :  { %v262_v44 = vadd.f32 %v261_v42, %v1598_v14 }
  0xd2   :  { %370 = vst [vmem:[#allocation2 + $0x60] sm:$0xff] %v221_v43 }
  0xd3   :  { %v343_v46 = vpop.f32.mrf.mxu3  ;;  %371 = vst [vmem:[#allocation2 + $0x68] sm:$0xff] %v262_v44 }
  0xd4   :  { %v302_v45 = vpop.f32.mrf.mxu2  ;;  %v344_v48 = vadd.f32 %v343_v46, %v1602_v16 }
  0xd5   :  { %v303_v47 = vadd.f32 %v302_v45, %v1600_v15 }
  0xd6   :  { %373 = vst [vmem:[#allocation2 + $0x78] sm:$0xff] %v344_v48 }
  0xd7   :  { %372 = vst [vmem:[#allocation2 + $0x70] sm:$0xff] %v303_v47  ;;  %v223_v49 = vpop.f32.mrf.mxu0 }
  0xd8   :  { %v264_v50 = vpop.f32.mrf.mxu1  ;;  %v224_v51 = vadd.f32 %v223_v49, %v1596_v13 }
  0xd9   :  { %v265_v52 = vadd.f32 %v264_v50, %v1598_v14 }
  0xda   :  { %374 = vst [vmem:[#allocation2 + $0x80] sm:$0xff] %v224_v51 }
  0xdb   :  { %v346_v54 = vpop.f32.mrf.mxu3  ;;  %375 = vst [vmem:[#allocation2 + $0x88] sm:$0xff] %v265_v52 }
  0xdc   :  { %v305_v53 = vpop.f32.mrf.mxu2  ;;  %v347_v56 = vadd.f32 %v346_v54, %v1602_v16 }
  0xdd   :  { %v306_v55 = vadd.f32 %v305_v53, %v1600_v15 }
  0xde   :  { %377 = vst [vmem:[#allocation2 + $0x98] sm:$0xff] %v347_v56 }
  0xdf   :  { %376 = vst [vmem:[#allocation2 + $0x90] sm:$0xff] %v306_v55  ;;  %v226_v57 = vpop.f32.mrf.mxu0 }
  0xe0   :  { %v267_v58 = vpop.f32.mrf.mxu1  ;;  %v227_v59 = vadd.f32 %v226_v57, %v1596_v13 }
  0xe1   :  { %v268_v60 = vadd.f32 %v267_v58, %v1598_v14 }
  0xe2   :  { %378 = vst [vmem:[#allocation2 + $0xa0] sm:$0xff] %v227_v59 }
  0xe3   :  { %v349_v62 = vpop.f32.mrf.mxu3  ;;  %379 = vst [vmem:[#allocation2 + $0xa8] sm:$0xff] %v268_v60 }
  0xe4   :  { %v308_v61 = vpop.f32.mrf.mxu2  ;;  %v350_v2 = vadd.f32 %v349_v62, %v1602_v16 }
  0xe5   :  { %v309_v63 = vadd.f32 %v308_v61, %v1600_v15 }
  0xe6   :  { %381 = vst [vmem:[#allocation2 + $0xb8] sm:$0xff] %v350_v2 }
  0xe7   :  { %380 = vst [vmem:[#allocation2 + $0xb0] sm:$0xff] %v309_v63  ;;  %v229_v3 = vpop.f32.mrf.mxu0 }
  0xe8   :  { %v270_v4 = vpop.f32.mrf.mxu1  ;;  %v230_v5 = vadd.f32 %v229_v3, %v1596_v13 }
  0xe9   :  { %v271_v6 = vadd.f32 %v270_v4, %v1598_v14 }
  0xea   :  { %382 = vst [vmem:[#allocation2 + $0xc0] sm:$0xff] %v230_v5 }
  0xeb   :  { %v352_v8 = vpop.f32.mrf.mxu3  ;;  %383 = vst [vmem:[#allocation2 + $0xc8] sm:$0xff] %v271_v6 }
  0xec   :  { %v311_v7 = vpop.f32.mrf.mxu2  ;;  %v353_v10 = vadd.f32 %v352_v8, %v1602_v16 }
  0xed   :  { %v312_v9 = vadd.f32 %v311_v7, %v1600_v15 }
  0xee   :  { %385 = vst [vmem:[#allocation2 + $0xd8] sm:$0xff] %v353_v10 }
  0xef   :  { %384 = vst [vmem:[#allocation2 + $0xd0] sm:$0xff] %v312_v9  ;;  %v232_v11 = vpop.f32.mrf.mxu0 }
  0xf0   :  { %v273_v12 = vpop.f32.mrf.mxu1  ;;  %v233_v17 = vadd.f32 %v232_v11, %v1596_v13 }
  0xf1   :  { %v274_v18 = vadd.f32 %v273_v12, %v1598_v14 }
  0xf2   :  { %386 = vst [vmem:[#allocation2 + $0xe0] sm:$0xff] %v233_v17 }
  0xf3   :  { %v355_v20 = vpop.f32.mrf.mxu3  ;;  %387 = vst [vmem:[#allocation2 + $0xe8] sm:$0xff] %v274_v18 }
  0xf4   :  { %v314_v19 = vpop.f32.mrf.mxu2  ;;  %v356_v22 = vadd.f32 %v355_v20, %v1602_v16 }
  0xf5   :  { %v315_v21 = vadd.f32 %v314_v19, %v1600_v15 }
  0xf6   :  { %389 = vst [vmem:[#allocation2 + $0xf8] sm:$0xff] %v356_v22 }
  0xf7   :  { %388 = vst [vmem:[#allocation2 + $0xf0] sm:$0xff] %v315_v21 }
  0xf8 LB: > { %v470_v13 = vld [vmem:[#allocation12 + $0x1e0] sm:$0xff]  ;;  %v471_v23 = vld [vmem:[#allocation12 + $0x1e8] sm:$0xff]  ;;  %v473_v14 = vld [vmem:[#allocation12 + $0x1f8] sm:$0xff]  ;;  %v621_v11 = vstv %s1486_s4  ;;  %s1220_s15 = sshll.u32 %s1486_s4, 3  ;;  %s397_s4 = sadd.s32 1, %s1486_s4   ;;  %s1486_s4 = sphi %s1636_s4, %s397_s4  }
  0xf9   : > { %474 = vmatpush.msra.mxu0 %v470_v13  ;;  %494 = vmatpush.msra.mxu1 %v471_v23  ;;  %v466_v24 = vld [vmem:[#allocation12 + $0x1c0] sm:$0xff]  ;;  %v467_v25 = vld [vmem:[#allocation12 + $0x1c8] sm:$0xff]  ;;  %v469_v15 = vld [vmem:[#allocation12 + $0x1d8] sm:$0xff]  ;;  %vm622_vm0 = vcmp.lt.s32.totalorder %v621_v11, %v1591_v1  ;;  %v1502_v13 = vmov 0   ;;  %s401_s16 = sshra.s32 %s1220_s15, 3  ;;  %s633_s19 = scalar_lea.vmem [#allocation3], %s1220_s15 }
  0xfa   : > { %534 = vmatpush.msra.mxu3 %v473_v14  ;;  %v462_v16 = vld [vmem:[#allocation12 + $0x1a0] sm:$0xff]  ;;  %v463_v26 = vld [vmem:[#allocation12 + $0x1a8] sm:$0xff]  ;;  %v465_v27 = vld [vmem:[#allocation12 + $0x1b8] sm:$0xff]  ;;  %v623_v23 = vsel %vm622_vm0, 1, %v1502_v13  ;;  %1264 = vset.pattern.permute.xlu0 %v1502_v13  ;;  %s1232_s17 = sshll.u32 %s401_s16, 5  ;;  %p394_p0 = scmp.ge.s32.totalorder %s397_s4, 8  }
  0xfb   : > { %475 = vmatpush.msra.mxu0 %v466_v24  ;;  %495 = vmatpush.msra.mxu1 %v467_v25  ;;  %v458_v28 = vld [vmem:[#allocation12 + $0x180] sm:$0xff]  ;;  %v459_v29 = vld [vmem:[#allocation12 + $0x188] sm:$0xff]  ;;  %v461_v30 = vld [vmem:[#allocation12 + $0x198] sm:$0xff]  ;;  %s405_s18 = scalar_lea.vmem [#allocation2], %s1232_s17 }
  0xfc   : > { %535 = vmatpush.msra.mxu3 %v469_v15  ;;  %v454_v31 = vld [vmem:[#allocation12 + $0x160] sm:$0xff]  ;;  %v455_v32 = vld [vmem:[#allocation12 + $0x168] sm:$0xff]  ;;  %v457_v33 = vld [vmem:[#allocation12 + $0x178] sm:$0xff]  ;;  %625 = vperm.xlu0 %1264, %v623_v23  }
  0xfd   : > { %476 = vmatpush.msra.mxu0 %v462_v16  ;;  %496 = vmatpush.msra.mxu1 %v463_v26  ;;  %v450_v34 = vld [vmem:[#allocation12 + $0x140] sm:$0xff]  ;;  %v451_v35 = vld [vmem:[#allocation12 + $0x148] sm:$0xff]  ;;  %v472_v36 = vld [vmem:[#allocation12 + $0x1f0] sm:$0xff] }
  0xfe   : > { %536 = vmatpush.msra.mxu3 %v465_v27  ;;  %v453_v37 = vld [vmem:[#allocation12 + $0x158] sm:$0xff]  ;;  %v468_v38 = vld [vmem:[#allocation12 + $0x1d0] sm:$0xff]  ;;  %v446_v39 = vld [vmem:[#allocation12 + $0x120] sm:$0xff]  ;;  %514 = vmatpush.msra.mxu2 %v472_v36 }
  0xff   : > { %477 = vmatpush.msra.mxu0 %v458_v28  ;;  %497 = vmatpush.msra.mxu1 %v459_v29  ;;  %v447_v40 = vld [vmem:[#allocation12 + $0x128] sm:$0xff]  ;;  %v449_v41 = vld [vmem:[#allocation12 + $0x138] sm:$0xff]  ;;  %v464_v42 = vld [vmem:[#allocation12 + $0x1b0] sm:$0xff] }
 0x100   : > { %537 = vmatpush.msra.mxu3 %v461_v30  ;;  %v442_v43 = vld [vmem:[#allocation12 + $0x100] sm:$0xff]  ;;  %v443_v44 = vld [vmem:[#allocation12 + $0x108] sm:$0xff]  ;;  %515 = vmatpush.msra.mxu2 %v468_v38  ;;  %v445_v45 = vld [vmem:[#allocation12 + $0x118] sm:$0xff] }
 0x101   : > { %478 = vmatpush.msra.mxu0 %v454_v31  ;;  %498 = vmatpush.msra.mxu1 %v455_v32  ;;  %v460_v46 = vld [vmem:[#allocation12 + $0x190] sm:$0xff]  ;;  %v438_v47 = vld [vmem:[#allocation12 + $0xe0] sm:$0xff]  ;;  %v439_v48 = vld [vmem:[#allocation12 + $0xe8] sm:$0xff] }
 0x102   : > { %538 = vmatpush.msra.mxu3 %v457_v33  ;;  %516 = vmatpush.msra.mxu2 %v464_v42  ;;  %v441_v49 = vld [vmem:[#allocation12 + $0xf8] sm:$0xff]  ;;  %v456_v50 = vld [vmem:[#allocation12 + $0x170] sm:$0xff]  ;;  %v434_v51 = vld [vmem:[#allocation12 + $0xc0] sm:$0xff] }
 0x103   : > { %479 = vmatpush.msra.mxu0 %v450_v34  ;;  %499 = vmatpush.msra.mxu1 %v451_v35  ;;  %v435_v52 = vld [vmem:[#allocation12 + $0xc8] sm:$0xff]  ;;  %v437_v53 = vld [vmem:[#allocation12 + $0xd8] sm:$0xff]  ;;  %v452_v54 = vld [vmem:[#allocation12 + $0x150] sm:$0xff] }
 0x104   : > { %539 = vmatpush.msra.mxu3 %v453_v37  ;;  %517 = vmatpush.msra.mxu2 %v460_v46  ;;  %v430_v55 = vld [vmem:[#allocation12 + $0xa0] sm:$0xff]  ;;  %v431_v56 = vld [vmem:[#allocation12 + $0xa8] sm:$0xff]  ;;  %v433_v57 = vld [vmem:[#allocation12 + $0xb8] sm:$0xff] }
 0x105   : > { %480 = vmatpush.msra.mxu0 %v446_v39  ;;  %500 = vmatpush.msra.mxu1 %v447_v40  ;;  %v448_v58 = vld [vmem:[#allocation12 + $0x130] sm:$0xff]  ;;  %v426_v59 = vld [vmem:[#allocation12 + $0x80] sm:$0xff]  ;;  %v427_v60 = vld [vmem:[#allocation12 + $0x88] sm:$0xff] }
 0x106   : > { %540 = vmatpush.msra.mxu3 %v449_v41  ;;  %518 = vmatpush.msra.mxu2 %v456_v50  ;;  %v429_v61 = vld [vmem:[#allocation12 + $0x98] sm:$0xff]  ;;  %v444_v62 = vld [vmem:[#allocation12 + $0x110] sm:$0xff]  ;;  %v422_v63 = vld [vmem:[#allocation12 + $0x60] sm:$0xff] }
 0x107   : > { %481 = vmatpush.msra.mxu0 %v442_v43  ;;  %501 = vmatpush.msra.mxu1 %v443_v44  ;;  %v423_v2 = vld [vmem:[#allocation12 + $0x68] sm:$0xff]  ;;  %v425_v3 = vld [vmem:[#allocation12 + $0x78] sm:$0xff]  ;;  %v440_v4 = vld [vmem:[#allocation12 + $0xf0] sm:$0xff] }
 0x108   : > { %541 = vmatpush.msra.mxu3 %v445_v45  ;;  %519 = vmatpush.msra.mxu2 %v452_v54  ;;  %v418_v5 = vld [vmem:[#allocation12 + $0x40] sm:$0xff]  ;;  %v419_v6 = vld [vmem:[#allocation12 + $0x48] sm:$0xff]  ;;  %v421_v7 = vld [vmem:[#allocation12 + $0x58] sm:$0xff] }
 0x109   : > { %482 = vmatpush.msra.mxu0 %v438_v47  ;;  %502 = vmatpush.msra.mxu1 %v439_v48  ;;  %v436_v8 = vld [vmem:[#allocation12 + $0xd0] sm:$0xff]  ;;  %v414_v9 = vld [vmem:[#allocation12 + $0x20] sm:$0xff]  ;;  %v415_v10 = vld [vmem:[#allocation12 + $0x28] sm:$0xff] }
 0x10a   : > { %542 = vmatpush.msra.mxu3 %v441_v49  ;;  %520 = vmatpush.msra.mxu2 %v448_v58  ;;  %v417_v12 = vld [vmem:[#allocation12 + $0x38] sm:$0xff]  ;;  %v432_v17 = vld [vmem:[#allocation12 + $0xb0] sm:$0xff]  ;;  %v410_v18 = vld [vmem:[#allocation12] sm:$0xff] }
 0x10b   : > { %483 = vmatpush.msra.mxu0 %v434_v51  ;;  %503 = vmatpush.msra.mxu1 %v435_v52  ;;  %v411_v19 = vld [vmem:[#allocation12 + $0x8] sm:$0xff]  ;;  %v413_v20 = vld [vmem:[#allocation12 + $0x18] sm:$0xff]  ;;  %v1642_v21 = vld [vmem:[#allocation5] sm:$0xff] }
 0x10c   : > { %543 = vmatpush.msra.mxu3 %v437_v53  ;;  %521 = vmatpush.msra.mxu2 %v444_v62  ;;  %v428_v22 = vld [vmem:[#allocation12 + $0x90] sm:$0xff]  ;;  %v407_v26 = vld [vmem:[%s405_s18 + $0x8] sm:$0xff]  ;;  %v409_v33 = vld [vmem:[%s405_s18 + $0x18] sm:$0xff] }
 0x10d   : > { %484 = vmatpush.msra.mxu0 %v430_v55  ;;  %504 = vmatpush.msra.mxu1 %v431_v56  ;;  %v424_v14 = vld [vmem:[#allocation12 + $0x70] sm:$0xff]  ;;  %v408_v41 = vld [vmem:[%s405_s18 + $0x10] sm:$0xff] }
 0x10e   : > { %544 = vmatpush.msra.mxu3 %v433_v57  ;;  %522 = vmatpush.msra.mxu2 %v440_v4  ;;  %v420_v24 = vld [vmem:[#allocation12 + $0x50] sm:$0xff] }
 0x10f   : > { %485 = vmatpush.msra.mxu0 %v426_v59  ;;  %505 = vmatpush.msra.mxu1 %v427_v60  ;;  %v416_v25 = vld [vmem:[#allocation12 + $0x30] sm:$0xff] }
 0x110   : > { %545 = vmatpush.msra.mxu3 %v429_v61  ;;  %523 = vmatpush.msra.mxu2 %v436_v8  ;;  %v412_v15 = vld [vmem:[#allocation12 + $0x10] sm:$0xff] }
 0x111   : > { %486 = vmatpush.msra.mxu0 %v422_v63  ;;  %506 = vmatpush.msra.mxu1 %v423_v2  ;;  %v406_v16 = vld [vmem:[%s405_s18] sm:$0xff] }
 0x112   : > { %546 = vmatpush.msra.mxu3 %v425_v3  ;;  %524 = vmatpush.msra.mxu2 %v432_v17  ;;  %v400_v3 = vld [vmem:[#allocation6] sm:$0xff] }
 0x113   : > { %487 = vmatpush.msra.mxu0 %v418_v5  ;;  %507 = vmatpush.msra.mxu1 %v419_v6 }
 0x114   : > { %547 = vmatpush.msra.mxu3 %v421_v7  ;;  %525 = vmatpush.msra.mxu2 %v428_v22 }
 0x115   : > { %488 = vmatpush.msra.mxu0 %v414_v9  ;;  %508 = vmatpush.msra.mxu1 %v415_v10 }
 0x116   : > { %548 = vmatpush.msra.mxu3 %v417_v12  ;;  %526 = vmatpush.msra.mxu2 %v424_v14 }
 0x117   : > { %489 = vmatpush.msra.mxu0 %v410_v18  ;;  %509 = vmatpush.msra.mxu1 %v411_v19 }
 0x118   : > { %549 = vmatpush.msra.mxu3 %v413_v20  ;;  %490 = vmatmul.f32.vlgmr.msra.gmra.mxu0 %v1642_v21 }
 0x119   : > { %510 = vmatmul.f32.vlgmr.msra.gmra.mxu1 %v1642_v21  ;;  %550 = vmatmul.f32.vlgmr.msra.gmra.mxu3 %v1642_v21 }
 0x11a   : > { %527 = vmatpush.msra.mxu2 %v420_v24 }
 0x11c   : > { %528 = vmatpush.msra.mxu2 %v416_v25 }
 0x11e   : > { %529 = vmatpush.msra.mxu2 %v412_v15 }
 0x11f   : > { %530 = vmatmul.f32.vlgmr.msra.gmra.mxu2 %v1642_v21 }
 0x16e   : > { %v626_v6 = vpop.permute.xlu0 %625 }
 0x16f   : > { %vm627_vm9 = vcmp.eq.s32.totalorder %v626_v6, 1  ;;  %v664_v6 = vld [vmem:[#allocation13 + $0x98] sm:$0xff] (%p394_p0) }
 0x195   : > { %v491_v27 = vpop.f32.mrf.mxu0 }
 0x196   : > { %v554_v28 = vadd.f32 %v491_v27, %v406_v16  ;;  %v511_v29 = vpop.f32.mrf.mxu1  ;;  %v708_v27 = vld [vmem:[#allocation13 + $0x1f8] sm:$0xff] (%p394_p0) }
 0x197   : > { %v555_v30 = vadd.f32 %v511_v29, %v407_v26  ;;  %v707_v26 = vld [vmem:[#allocation13 + $0x1f0] sm:$0xff] (%p394_p0)  ;;  %842 = vmatpush.msra.mxu3 (%p394_p0), %v708_v27  ;;  %v645_v27 = vld [vmem:[#allocation13] sm:$0xff] (%p394_p0) }
 0x198   : > { %v1223_v31 = vmul.f32 -1.442695, %v554_v28  ;;  %v703_v28 = vld [vmem:[#allocation13 + $0x1d0] sm:$0xff] (%p394_p0)  ;;  %801 = vmatpush.msra.mxu2 (%p394_p0), %v707_v26  ;;  %v650_v26 = vld [vmem:[#allocation13 + $0x28] sm:$0xff] (%p394_p0) }
 0x199   : > { %v1224_v32 = vmul.f32 -1.442695, %v555_v30  ;;  %v699_v29 = vld [vmem:[#allocation13 + $0x1b0] sm:$0xff] (%p394_p0)  ;;  %v700_v30 = vld [vmem:[#allocation13 + $0x1b8] sm:$0xff] (%p394_p0) }
 0x19a   : > { %1265 = vpow2.f32 %v1223_v31  ;;  %802 = vmatpush.msra.mxu2 (%p394_p0), %v703_v28  ;;  %v646_v28 = vld [vmem:[#allocation13 + $0x8] sm:$0xff] (%p394_p0) }
 0x19b   : > { %1267 = vpow2.f32 %v1224_v32  ;;  %v705_v32 = vld [vmem:[#allocation13 + $0x1e0] sm:$0xff] (%p394_p0) }
 0x19c   : > { %v551_v34 = vpop.f32.mrf.mxu3  ;;  %719 = vmatpush.msra.mxu0 (%p394_p0), %v705_v32  ;;  %803 = vmatpush.msra.mxu2 (%p394_p0), %v699_v29 }
 0x19d   : > { %v557_v35 = vadd.f32 %v551_v34, %v409_v33  ;;  %v706_v33 = vld [vmem:[#allocation13 + $0x1e8] sm:$0xff] (%p394_p0)  ;;  %v701_v34 = vld [vmem:[#allocation13 + $0x1c0] sm:$0xff] (%p394_p0) }
 0x19e   :  { %760 = vmatpush.msra.mxu1 (%p394_p0), %v706_v33  ;;  %720 = vmatpush.msra.mxu0 (%p394_p0), %v701_v34 }
 0x19f   : > { %v1225_v36 = vmul.f32 -1.442695, %v557_v35  ;;  %v695_v35 = vld [vmem:[#allocation13 + $0x190] sm:$0xff] (%p394_p0) }
 0x1a0   : > { %v1266_v37 = vpop.eup %1265  ;;  %804 = vmatpush.msra.mxu2 (%p394_p0), %v695_v35  ;;  %v709_v35 = vld [vmem:[%s1750_s7] sm:$0xf] (%p394_p0)  ;;  %s1706_s7 = smov (%p394_p0), 0  }
 0x1a1   : > { %v1268_v38 = vpop.eup %1267  ;;  %v561_v39 = vadd.f32 1.0, %v1266_v37  ;;  %1269 = vpow2.f32 %v1225_v36  ;;  %v696_v36 = vld [vmem:[#allocation13 + $0x198] sm:$0xff] (%p394_p0)  ;;  %v702_v37 = vld [vmem:[#allocation13 + $0x1c8] sm:$0xff] (%p394_p0) }
 0x1a2   : > { %v580_v40 = vadd.f32 1.0, %v1268_v38  ;;  %v531_v42 = vpop.f32.mrf.mxu2  ;;  %v697_v38 = vld [vmem:[#allocation13 + $0x1a0] sm:$0xff] (%p394_p0)  ;;  %761 = vmatpush.msra.mxu1 (%p394_p0), %v702_v37  ;;  %v1668_v37 = vperm.slane (%p394_p0), %v709_v35, 1 }
 0x1a3   : > { %1271 = vrcp.f32 %v561_v39  ;;  %v556_v44 = vadd.f32 %v531_v42, %v408_v41  ;;  %v573_v52 = vand.u32 2147483648, %v561_v39  ;;  %v571_v54 = vand.u32 2147483647, %v561_v39  ;;  %v692_v41 = vld [vmem:[#allocation13 + $0x178] sm:$0xff] (%p394_p0)  ;;  %v693_v42 = vld [vmem:[#allocation13 + $0x180] sm:$0xff] (%p394_p0)  ;;  %721 = vmatpush.msra.mxu0 (%p394_p0), %v697_v38 }
 0x1a4   : > { %1273 = vrcp.f32 %v580_v40  ;;  %v592_v55 = vand.u32 2147483648, %v580_v40  ;;  %v590_v57 = vand.u32 2147483647, %v580_v40  ;;  %vm567_vm3 = vweird.f32 %v561_v39 }
 0x1a5   : > { %v574_v62 = vor.u32 1.1754944e-38, %v573_v52  ;;  %vm586_vm5 = vweird.f32 %v580_v40  ;;  %vm572_vm6 = vcmp.eq.f32.partialorder %v571_v54, 8.507059e+37  ;;  %722 = vmatpush.msra.mxu0 (%p394_p0), %v693_v42  ;;  %v680_v52 = vld [vmem:[#allocation13 + $0x118] sm:$0xff] (%p394_p0)  ;;  %v682_v54 = vld [vmem:[#allocation13 + $0x128] sm:$0xff] (%p394_p0)  ;;  %v1670_v38 = vperm.slane (%p394_p0), %v709_v35, 2 }
 0x1a6   : > { %v593_v4 = vor.u32 1.1754944e-38, %v592_v55  ;;  %vm591_vm8 = vcmp.eq.f32.partialorder %v590_v57, 8.507059e+37  ;;  %v675_v55 = vld [vmem:[#allocation13 + $0xf0] sm:$0xff] (%p394_p0)  ;;  %v677_v57 = vld [vmem:[#allocation13 + $0x100] sm:$0xff] (%p394_p0) }
 0x1a7   : > { %v1270_v43 = vpop.eup %1269 }
 0x1a8   : > { %v600_v45 = vadd.f32 1.0, %v1270_v43  ;;  %v694_v43 = vld [vmem:[#allocation13 + $0x188] sm:$0xff] (%p394_p0) }
 0x1a9   : > { %v1272_v46 = vpop.eup %1271 }
 0x1aa   : > { %v1274_v47 = vpop.eup %1273  ;;  %v563_v48 = vmul.f32 %v1272_v46, %v561_v39  ;;  %1275 = vrcp.f32 %v600_v45  ;;  %vm568_vm1 = vweird.f32 %v1272_v46  ;;  %v612_v19 = vand.u32 2147483648, %v600_v45  ;;  %v698_v39 = vld [vmem:[#allocation13 + $0x1a8] sm:$0xff] (%p394_p0) }
 0x1ab   : > { %v582_v49 = vmul.f32 %v1274_v47, %v580_v40  ;;  %1277 = vtanh.f32 %v556_v44  ;;  %vm587_vm2 = vweird.f32 %v1274_v47  ;;  %vm569_vm4 = vmor %vm567_vm3, %vm568_vm1  ;;  %vm606_vm11 = vweird.f32 %v600_v45  ;;  %v691_v40 = vld [vmem:[#allocation13 + $0x170] sm:$0xff] (%p394_p0)  ;;  %762 = vmatpush.msra.mxu1 (%p394_p0), %v698_v39 }
 0x1ac   : > { %v564_v50 = vsub.f32 1.0, %v563_v48  ;;  %vm588_vm7 = vmor %vm586_vm5, %vm587_vm2  ;;  %v610_v22 = vand.u32 2147483647, %v600_v45  ;;  %v613_v23 = vor.u32 1.1754944e-38, %v612_v19  ;;  %v687_v44 = vld [vmem:[#allocation13 + $0x150] sm:$0xff] (%p394_p0)  ;;  %805 = vmatpush.msra.mxu2 (%p394_p0), %v691_v40  ;;  %v684_v48 = vld [vmem:[#allocation13 + $0x138] sm:$0xff] (%p394_p0) }
 0x1ad   : > { %v583_v51 = vsub.f32 1.0, %v582_v49  ;;  %763 = vmatpush.msra.mxu1 (%p394_p0), %v694_v43  ;;  %v685_v49 = vld [vmem:[#allocation13 + $0x140] sm:$0xff] (%p394_p0)  ;;  %v1672_v39 = vperm.slane (%p394_p0), %v709_v35, 3 }
 0x1ae   : > { %v565_v53 = vmul.f32 %v1272_v46, %v564_v50  ;;  %vm611_vm13 = vcmp.eq.f32.partialorder %v610_v22, 8.507059e+37  ;;  %806 = vmatpush.msra.mxu2 (%p394_p0), %v687_v44  ;;  %v686_v50 = vld [vmem:[#allocation13 + $0x148] sm:$0xff] (%p394_p0)  ;;  %v657_v19 = vld [vmem:[#allocation13 + $0x60] sm:$0xff] (%p394_p0)  ;;  %v651_v22 = vld [vmem:[#allocation13 + $0x30] sm:$0xff] (%p394_p0) }
 0x1af   : > { %v584_v56 = vmul.f32 %v1274_v47, %v583_v51  ;;  %v679_v51 = vld [vmem:[#allocation13 + $0x110] sm:$0xff] (%p394_p0) }
 0x1b0   : > { %v1276_v58 = vpop.eup %1275  ;;  %v566_v59 = vadd.f32 %v1272_v46, %v565_v53  ;;  %v681_v53 = vld [vmem:[#allocation13 + $0x120] sm:$0xff] (%p394_p0) }
 0x1b1   : > { %v1278_v60 = vpop.eup %1277  ;;  %v602_v61 = vmul.f32 %v1276_v58, %v600_v45  ;;  %v585_v63 = vadd.f32 %v1274_v47, %v584_v56  ;;  %vm607_vm10 = vweird.f32 %v1276_v58  ;;  %v689_v45 = vld [vmem:[#allocation13 + $0x160] sm:$0xff] (%p394_p0)  ;;  %v676_v56 = vld [vmem:[#allocation13 + $0xf8] sm:$0xff] (%p394_p0) }
 0x1b2   : > { %v570_v2 = vsel %vm569_vm4, %v1272_v46, %v566_v59  ;;  %vm608_vm12 = vmor %vm606_vm11, %vm607_vm10  ;;  %v690_v46 = vld [vmem:[#allocation13 + $0x168] sm:$0xff] (%p394_p0)  ;;  %723 = vmatpush.msra.mxu0 (%p394_p0), %v689_v45  ;;  %v671_v59 = vld [vmem:[#allocation13 + $0xd0] sm:$0xff] (%p394_p0) }
 0x1b3   : > { %v575_v5 = vsel %vm572_vm6, %v574_v62, %v570_v2  ;;  %v589_v7 = vsel %vm588_vm7, %v1274_v47, %v585_v63  ;;  %v603_v8 = vsub.f32 1.0, %v602_v61  ;;  %v683_v47 = vld [vmem:[#allocation13 + $0x130] sm:$0xff] (%p394_p0)  ;;  %764 = vmatpush.msra.mxu1 (%p394_p0), %v690_v46  ;;  %v673_v61 = vld [vmem:[#allocation13 + $0xe0] sm:$0xff] (%p394_p0)  ;;  %v674_v62 = vld [vmem:[#allocation13 + $0xe8] sm:$0xff] (%p394_p0) }
 0x1b4   : > { %v617_v9 = vmul.f32 %v1278_v60, %v575_v5  ;;  %v594_v10 = vsel %vm591_vm8, %v593_v4, %v589_v7  ;;  %807 = vmatpush.msra.mxu2 (%p394_p0), %v683_v47  ;;  %724 = vmatpush.msra.mxu0 (%p394_p0), %v685_v49  ;;  %v672_v60 = vld [vmem:[#allocation13 + $0xd8] sm:$0xff] (%p394_p0)  ;;  %v667_v63 = vld [vmem:[#allocation13 + $0xb0] sm:$0xff] (%p394_p0)  ;;  %v670_v4 = vld [vmem:[#allocation13 + $0xc8] sm:$0xff] (%p394_p0) }
 0x1b5   : > { %v604_v11 = vmul.f32 %v1276_v58, %v603_v8  ;;  %v616_v12 = vmul.f32 %v594_v10, %v400_v3  ;;  %765 = vmatpush.msra.mxu1 (%p394_p0), %v686_v50  ;;  %v668_v2 = vld [vmem:[#allocation13 + $0xb8] sm:$0xff] (%p394_p0)  ;;  %v663_v5 = vld [vmem:[#allocation13 + $0x90] sm:$0xff] (%p394_p0)  ;;  %v665_v7 = vld [vmem:[#allocation13 + $0xa0] sm:$0xff] (%p394_p0) }
 0x1b6   :  { %808 = vmatpush.msra.mxu2 (%p394_p0), %v679_v51  ;;  %725 = vmatpush.msra.mxu0 (%p394_p0), %v681_v53  ;;  %v666_v8 = vld [vmem:[#allocation13 + $0xa8] sm:$0xff] (%p394_p0)  ;;  %v660_v10 = vld [vmem:[#allocation13 + $0x78] sm:$0xff] (%p394_p0) }
 0x1b7   : > { %v618_v17 = vadd.f32 %v617_v9, %v616_v12  ;;  %v605_v18 = vadd.f32 %v1276_v58, %v604_v11  ;;  %766 = vmatpush.msra.mxu1 (%p394_p0), %v682_v54  ;;  %v659_v9 = vld [vmem:[#allocation13 + $0x70] sm:$0xff] (%p394_p0)  ;;  %v661_v11 = vld [vmem:[#allocation13 + $0x80] sm:$0xff] (%p394_p0)  ;;  %v662_v12 = vld [vmem:[#allocation13 + $0x88] sm:$0xff] (%p394_p0) }
 0x1b8   :  { %809 = vmatpush.msra.mxu2 (%p394_p0), %v675_v55  ;;  %726 = vmatpush.msra.mxu0 (%p394_p0), %v677_v57 }
 0x1b9   : > { %1279 = vtanh.f32 %v618_v17  ;;  %v630_v20 = vsel %vm627_vm9, %v618_v17, %v400_v3  ;;  %v609_v13 = vsel %vm608_vm12, %v1276_v58, %v605_v18  ;;  %v678_v58 = vld [vmem:[#allocation13 + $0x108] sm:$0xff] (%p394_p0)  ;;  %v669_v3 = vld [vmem:[#allocation13 + $0xc0] sm:$0xff] (%p394_p0)  ;;  %v655_v17 = vld [vmem:[#allocation13 + $0x50] sm:$0xff] (%p394_p0) }
 0x1ba   : > { %631 = vst [vmem:[#allocation6] sm:$0xff] %v630_v20  ;;  %v614_v24 = vsel %vm611_vm13, %v613_v23, %v609_v13  ;;  %767 = vmatpush.msra.mxu1 (%p394_p0), %v678_v58  ;;  %810 = vmatpush.msra.mxu2 (%p394_p0), %v671_v59  ;;  %v656_v18 = vld [vmem:[#allocation13 + $0x58] sm:$0xff] (%p394_p0)  ;;  %v658_v20 = vld [vmem:[#allocation13 + $0x68] sm:$0xff] (%p394_p0)  ;;  %v653_v23 = vld [vmem:[#allocation13 + $0x40] sm:$0xff] (%p394_p0) }
 0x1bb   :  { %916 = vst [vmem:[#allocation6] sm:$0xff] (%p394_p0), %v1501_v0  ;;  %727 = vmatpush.msra.mxu0 (%p394_p0), %v673_v61  ;;  %v652_v13 = vld [vmem:[#allocation13 + $0x38] sm:$0xff] (%p394_p0) }
 0x1bc   :  { %768 = vmatpush.msra.mxu1 (%p394_p0), %v674_v62  ;;  %811 = vmatpush.msra.mxu2 (%p394_p0), %v667_v63 }
 0x1bd   :  { %728 = vmatpush.msra.mxu0 (%p394_p0), %v669_v3 }
 0x1be   :  { %769 = vmatpush.msra.mxu1 (%p394_p0), %v670_v4  ;;  %812 = vmatpush.msra.mxu2 (%p394_p0), %v663_v5 }
 0x1bf   : > { %v1280_v14 = vpop.eup %1279  ;;  %729 = vmatpush.msra.mxu0 (%p394_p0), %v665_v7 }
 0x1c0   : > { %v620_v25 = vmul.f32 %v1280_v14, %v614_v24  ;;  %396 = sbr.rel (!%p394_p0) target bundleno = 248 (0xf8), region = 99  ;;  %770 = vmatpush.msra.mxu1 (%p394_p0), %v666_v8  ;;  %813 = vmatpush.msra.mxu2 (%p394_p0), %v659_v9  ;;  %v654_v14 = vld [vmem:[#allocation13 + $0x48] sm:$0xff] (%p394_p0)  ;;  %v647_v24 = vld [vmem:[#allocation13 + $0x10] sm:$0xff] (%p394_p0) }
 0x1c1   :  { %730 = vmatpush.msra.mxu0 (%p394_p0), %v661_v11 }
 0x1c2   : > { %v628_v15 = vsel %vm627_vm9, %v620_v25, %v1642_v21  ;;  %v632_v16 = vsel %vm627_vm9, %v620_v25, 0.0  ;;  %v704_v21 = vld [vmem:[#allocation13 + $0x1d8] sm:$0xff] (%p394_p0)  ;;  %771 = vmatpush.msra.mxu1 (%p394_p0), %v662_v12  ;;  %814 = vmatpush.msra.mxu2 (%p394_p0), %v655_v17 }
 0x1c3   : > { %629 = vst [vmem:[#allocation5] sm:$0xff] %v628_v15  ;;  %843 = vmatpush.msra.mxu3 (%p394_p0), %v704_v21  ;;  %731 = vmatpush.msra.mxu0 (%p394_p0), %v657_v19  ;;  %v648_v25 = vld [vmem:[#allocation13 + $0x18] sm:$0xff] (%p394_p0) }
 0x1c4   : > { %634 = vst [vmem:[%s633_s19] sm:$0xff] %v632_v16  ;;  %772 = vmatpush.msra.mxu1 (%p394_p0), %v658_v20  ;;  %815 = vmatpush.msra.mxu2 (%p394_p0), %v651_v22  ;;  %v649_v16 = vld [vmem:[#allocation13 + $0x20] sm:$0xff] (%p394_p0) }
 0x1c5   :  { %844 = vmatpush.msra.mxu3 %v700_v30  ;;  %732 = vmatpush.msra.mxu0 %v653_v23 }
 0x1c6   :  { %773 = vmatpush.msra.mxu1 %v654_v14  ;;  %816 = vmatpush.msra.mxu2 %v647_v24 }
 0x1c7   :  { %845 = vmatpush.msra.mxu3 %v696_v36  ;;  %733 = vmatpush.msra.mxu0 %v649_v16  ;;  %v1666_v36 = vperm.slane %v709_v35, 0 }
 0x1c8   :  { %774 = vmatpush.msra.mxu1 %v650_v26 }
 0x1c9   :  { %846 = vmatpush.msra.mxu3 %v692_v41  ;;  %734 = vmatpush.msra.mxu0 %v645_v27 }
 0x1ca   :  { %v635_v31 = vld [vmem:[#allocation5] sm:$0xff]  ;;  %775 = vmatpush.msra.mxu1 %v646_v28 }
 0x1cb   :  { %636 = vst [vmem:[#allocation17] sm:$0xff] %v635_v31  ;;  %v637_v15 = vld [vmem:[#allocation3] sm:$0xff]  ;;  %v638_v21 = vld [vmem:[#allocation3 + $0x8] sm:$0xff]  ;;  %v639_v29 = vld [vmem:[#allocation3 + $0x10] sm:$0xff] }
 0x1cc   :  { %915 = vst [vmem:[#allocation5] sm:$0xff] %v1501_v0  ;;  %v688_v0 = vld [vmem:[#allocation13 + $0x158] sm:$0xff]  ;;  %817 = vmatmul.f32.vlgmr.msra.gmra.mxu2 %v637_v15  ;;  %735 = vmatmul.f32.vlgmr.msra.gmra.mxu0 %v637_v15  ;;  %v640_v30 = vld [vmem:[#allocation3 + $0x18] sm:$0xff]  ;;  %v641_v31 = vld [vmem:[#allocation3 + $0x20] sm:$0xff] }
 0x1cd   :  { %847 = vmatpush.msra.mxu3 %v688_v0  ;;  %776 = vmatmul.f32.vlgmr.msra.gmra.mxu1 %v637_v15  ;;  %v642_v32 = vld [vmem:[#allocation3 + $0x28] sm:$0xff]  ;;  %v643_v33 = vld [vmem:[#allocation3 + $0x30] sm:$0xff]  ;;  %v644_v34 = vld [vmem:[#allocation3 + $0x38] sm:$0xff] }
 0x1cf   :  { %848 = vmatpush.msra.mxu3 %v684_v48 }
 0x1d1   :  { %849 = vmatpush.msra.mxu3 %v680_v52 }
 0x1d3   :  { %850 = vmatpush.msra.mxu3 %v676_v56 }
 0x1d4   :  { %820 = vmatmul.f32.gmra.mxu2 %v638_v21  ;;  %738 = vmatmul.f32.gmra.mxu0 %v638_v21 }
 0x1d5   :  { %851 = vmatpush.msra.mxu3 %v672_v60  ;;  %779 = vmatmul.f32.gmra.mxu1 %v638_v21 }
 0x1d7   :  { %852 = vmatpush.msra.mxu3 %v668_v2 }
 0x1d9   :  { %853 = vmatpush.msra.mxu3 %v664_v6 }
 0x1db   :  { %854 = vmatpush.msra.mxu3 %v660_v10 }
 0x1dc   :  { %823 = vmatmul.f32.gmra.mxu2 %v639_v29  ;;  %741 = vmatmul.f32.gmra.mxu0 %v639_v29 }
 0x1dd   :  { %855 = vmatpush.msra.mxu3 %v656_v18  ;;  %782 = vmatmul.f32.gmra.mxu1 %v639_v29 }
 0x1df   :  { %856 = vmatpush.msra.mxu3 %v652_v13 }
 0x1e1   :  { %857 = vmatpush.msra.mxu3 %v648_v25 }
 0x1e2   :  { %858 = vmatmul.f32.vlgmr.msra.gmra.mxu3 %v637_v15 }
 0x1e4   :  { %826 = vmatmul.f32.gmra.mxu2 %v640_v30  ;;  %744 = vmatmul.f32.gmra.mxu0 %v640_v30 }
 0x1e5   :  { %785 = vmatmul.f32.gmra.mxu1 %v640_v30 }
 0x1ea   :  { %861 = vmatmul.f32.gmra.mxu3 %v638_v21 }
 0x1ec   :  { %829 = vmatmul.f32.gmra.mxu2 %v641_v31  ;;  %747 = vmatmul.f32.gmra.mxu0 %v641_v31 }
 0x1ed   :  { %788 = vmatmul.f32.gmra.mxu1 %v641_v31 }
 0x1f2   :  { %864 = vmatmul.f32.gmra.mxu3 %v639_v29 }
 0x1f4   :  { %832 = vmatmul.f32.gmra.mxu2 %v642_v32  ;;  %750 = vmatmul.f32.gmra.mxu0 %v642_v32 }
 0x1f5   :  { %791 = vmatmul.f32.gmra.mxu1 %v642_v32 }
 0x1fa   :  { %867 = vmatmul.f32.gmra.mxu3 %v640_v30 }
 0x1fc   :  { %835 = vmatmul.f32.gmra.mxu2 %v643_v33  ;;  %753 = vmatmul.f32.gmra.mxu0 %v643_v33 }
 0x1fd   :  { %794 = vmatmul.f32.gmra.mxu1 %v643_v33 }
 0x202   :  { %870 = vmatmul.f32.gmra.mxu3 %v641_v31 }
 0x204   :  { %838 = vmatmul.f32.gmra.mxu2 %v644_v34  ;;  %756 = vmatmul.f32.gmra.mxu0 %v644_v34 }
 0x205   :  { %797 = vmatmul.f32.gmra.mxu1 %v644_v34 }
 0x20a   :  { %873 = vmatmul.f32.gmra.mxu3 %v642_v32 }
 0x212   :  { %876 = vmatmul.f32.gmra.mxu3 %v643_v33 }
 0x21a   :  { %879 = vmatmul.f32.gmra.mxu3 %v644_v34 }
 0x249   :  { %v736_v40 = vpop.f32.mrf.mxu0 }
 0x24a   :  { %v777_v41 = vpop.f32.mrf.mxu1  ;;  %v737_v42 = vadd.f32 %v736_v40, %v1666_v36 }
 0x24b   :  { %v778_v43 = vadd.f32 %v777_v41, %v1668_v37 }
 0x24c   :  { %883 = vst [vmem:[#allocation2] sm:$0xff] %v737_v42 }
 0x24d   :  { %884 = vst [vmem:[#allocation2 + $0x8] sm:$0xff] %v778_v43 }
 0x24f   :  { %v818_v44 = vpop.f32.mrf.mxu2 }
 0x250   :  { %v819_v45 = vadd.f32 %v818_v44, %v1670_v38 }
 0x251   :  { %v739_v47 = vpop.f32.mrf.mxu0 }
 0x252   :  { %885 = vst [vmem:[#allocation2 + $0x10] sm:$0xff] %v819_v45  ;;  %v780_v48 = vpop.f32.mrf.mxu1  ;;  %v740_v49 = vadd.f32 %v739_v47, %v1666_v36 }
 0x253   :  { %v781_v50 = vadd.f32 %v780_v48, %v1668_v37 }
 0x254   :  { %887 = vst [vmem:[#allocation2 + $0x20] sm:$0xff] %v740_v49 }
 0x255   :  { %888 = vst [vmem:[#allocation2 + $0x28] sm:$0xff] %v781_v50 }
 0x257   :  { %v821_v51 = vpop.f32.mrf.mxu2 }
 0x258   :  { %v822_v53 = vadd.f32 %v821_v51, %v1670_v38 }
 0x259   :  { %v742_v55 = vpop.f32.mrf.mxu0 }
 0x25a   :  { %889 = vst [vmem:[#allocation2 + $0x30] sm:$0xff] %v822_v53  ;;  %v783_v56 = vpop.f32.mrf.mxu1  ;;  %v743_v57 = vadd.f32 %v742_v55, %v1666_v36 }
 0x25b   :  { %v784_v58 = vadd.f32 %v783_v56, %v1668_v37 }
 0x25c   :  { %891 = vst [vmem:[#allocation2 + $0x40] sm:$0xff] %v743_v57 }
 0x25d   :  { %892 = vst [vmem:[#allocation2 + $0x48] sm:$0xff] %v784_v58 }
 0x25f   :  { %v824_v59 = vpop.f32.mrf.mxu2 }
 0x260   :  { %v825_v61 = vadd.f32 %v824_v59, %v1670_v38 }
 0x261   :  { %v745_v63 = vpop.f32.mrf.mxu0 }
 0x262   :  { %893 = vst [vmem:[#allocation2 + $0x50] sm:$0xff] %v825_v61  ;;  %v786_v2 = vpop.f32.mrf.mxu1  ;;  %v746_v3 = vadd.f32 %v745_v63, %v1666_v36 }
 0x263   :  { %v787_v4 = vadd.f32 %v786_v2, %v1668_v37 }
 0x264   :  { %895 = vst [vmem:[#allocation2 + $0x60] sm:$0xff] %v746_v3 }
 0x265   :  { %v859_v0 = vpop.f32.mrf.mxu3  ;;  %896 = vst [vmem:[#allocation2 + $0x68] sm:$0xff] %v787_v4 }
 0x266   :  { %v860_v46 = vadd.f32 %v859_v0, %v1672_v39 }
 0x267   :  { %v827_v5 = vpop.f32.mrf.mxu2 }
 0x268   :  { %886 = vst [vmem:[#allocation2 + $0x18] sm:$0xff] %v860_v46  ;;  %v828_v7 = vadd.f32 %v827_v5, %v1670_v38 }
 0x269   :  { %v748_v9 = vpop.f32.mrf.mxu0 }
 0x26a   :  { %897 = vst [vmem:[#allocation2 + $0x70] sm:$0xff] %v828_v7  ;;  %v789_v10 = vpop.f32.mrf.mxu1  ;;  %v749_v11 = vadd.f32 %v748_v9, %v1666_v36 }
 0x26b   :  { %v790_v12 = vadd.f32 %v789_v10, %v1668_v37 }
 0x26c   :  { %899 = vst [vmem:[#allocation2 + $0x80] sm:$0xff] %v749_v11 }
 0x26d   :  { %v862_v52 = vpop.f32.mrf.mxu3  ;;  %900 = vst [vmem:[#allocation2 + $0x88] sm:$0xff] %v790_v12 }
 0x26e   :  { %v863_v54 = vadd.f32 %v862_v52, %v1672_v39 }
 0x26f   :  { %v830_v17 = vpop.f32.mrf.mxu2 }
 0x270   :  { %890 = vst [vmem:[#allocation2 + $0x38] sm:$0xff] %v863_v54  ;;  %v831_v19 = vadd.f32 %v830_v17, %v1670_v38 }
 0x271   :  { %v751_v22 = vpop.f32.mrf.mxu0 }
 0x272   :  { %901 = vst [vmem:[#allocation2 + $0x90] sm:$0xff] %v831_v19  ;;  %v792_v13 = vpop.f32.mrf.mxu1  ;;  %v752_v23 = vadd.f32 %v751_v22, %v1666_v36 }
 0x273   :  { %v793_v14 = vadd.f32 %v792_v13, %v1668_v37 }
 0x274   :  { %903 = vst [vmem:[#allocation2 + $0xa0] sm:$0xff] %v752_v23 }
 0x275   :  { %v865_v60 = vpop.f32.mrf.mxu3  ;;  %904 = vst [vmem:[#allocation2 + $0xa8] sm:$0xff] %v793_v14 }
 0x276   :  { %v866_v62 = vadd.f32 %v865_v60, %v1672_v39 }
 0x277   :  { %v833_v24 = vpop.f32.mrf.mxu2 }
 0x278   :  { %894 = vst [vmem:[#allocation2 + $0x58] sm:$0xff] %v866_v62  ;;  %v834_v15 = vadd.f32 %v833_v24, %v1670_v38 }
 0x279   :  { %v754_v26 = vpop.f32.mrf.mxu0 }
 0x27a   :  { %905 = vst [vmem:[#allocation2 + $0xb0] sm:$0xff] %v834_v15  ;;  %v795_v27 = vpop.f32.mrf.mxu1  ;;  %v755_v28 = vadd.f32 %v754_v26, %v1666_v36 }
 0x27b   :  { %v796_v21 = vadd.f32 %v795_v27, %v1668_v37 }
 0x27c   :  { %907 = vst [vmem:[#allocation2 + $0xc0] sm:$0xff] %v755_v28 }
 0x27d   :  { %v868_v6 = vpop.f32.mrf.mxu3  ;;  %908 = vst [vmem:[#allocation2 + $0xc8] sm:$0xff] %v796_v21 }
 0x27e   :  { %v869_v8 = vadd.f32 %v868_v6, %v1672_v39 }
 0x27f   :  { %v836_v29 = vpop.f32.mrf.mxu2 }
 0x280   :  { %898 = vst [vmem:[#allocation2 + $0x78] sm:$0xff] %v869_v8  ;;  %v837_v31 = vadd.f32 %v836_v29, %v1670_v38 }
 0x281   :  { %v757_v33 = vpop.f32.mrf.mxu0 }
 0x282   :  { %909 = vst [vmem:[#allocation2 + $0xd0] sm:$0xff] %v837_v31  ;;  %v798_v34 = vpop.f32.mrf.mxu1  ;;  %v758_v35 = vadd.f32 %v757_v33, %v1666_v36 }
 0x283   :  { %v799_v40 = vadd.f32 %v798_v34, %v1668_v37 }
 0x284   :  { %911 = vst [vmem:[#allocation2 + $0xe0] sm:$0xff] %v758_v35 }
 0x285   :  { %v871_v18 = vpop.f32.mrf.mxu3  ;;  %912 = vst [vmem:[#allocation2 + $0xe8] sm:$0xff] %v799_v40 }
 0x286   :  { %v872_v20 = vadd.f32 %v871_v18, %v1672_v39 }
 0x287   :  { %v839_v41 = vpop.f32.mrf.mxu2 }
 0x288   :  { %902 = vst [vmem:[#allocation2 + $0x98] sm:$0xff] %v872_v20  ;;  %v840_v43 = vadd.f32 %v839_v41, %v1670_v38 }
 0x28a   :  { %913 = vst [vmem:[#allocation2 + $0xf0] sm:$0xff] %v840_v43 }
 0x28d   :  { %v874_v25 = vpop.f32.mrf.mxu3 }
 0x28e   :  { %v875_v16 = vadd.f32 %v874_v25, %v1672_v39 }
 0x290   :  { %906 = vst [vmem:[#allocation2 + $0xb8] sm:$0xff] %v875_v16 }
 0x295   :  { %v877_v30 = vpop.f32.mrf.mxu3 }
 0x296   :  { %v878_v32 = vadd.f32 %v877_v30, %v1672_v39 }
 0x298   :  { %910 = vst [vmem:[#allocation2 + $0xd8] sm:$0xff] %v878_v32 }
 0x29d   :  { %v880_v42 = vpop.f32.mrf.mxu3 }
 0x29e   :  { %v881_v44 = vadd.f32 %v880_v42, %v1672_v39 }
 0x2a0   :  { %914 = vst [vmem:[#allocation2 + $0xf8] sm:$0xff] %v881_v44 }
 0x2a1 LB: > { %v995_v36 = vld [vmem:[#allocation15 + $0x1e0] sm:$0xff]  ;;  %v996_v0 = vld [vmem:[#allocation15 + $0x1e8] sm:$0xff]  ;;  %v998_v37 = vld [vmem:[#allocation15 + $0x1f8] sm:$0xff]  ;;  %v1146_v32 = vstv %s1490_s7  ;;  %v1503_v44 = vmov 0   ;;  %s1226_s2 = sshll.u32 %s1490_s7, 3  ;;  %s922_s7 = sadd.s32 1, %s1490_s7   ;;  %s1490_s7 = sphi %s1706_s7, %s922_s7  }
 0x2a2   : > { %999 = vmatpush.msra.mxu0 %v995_v36  ;;  %1019 = vmatpush.msra.mxu1 %v996_v0  ;;  %v991_v45 = vld [vmem:[#allocation15 + $0x1c0] sm:$0xff]  ;;  %v992_v46 = vld [vmem:[#allocation15 + $0x1c8] sm:$0xff]  ;;  %v994_v38 = vld [vmem:[#allocation15 + $0x1d8] sm:$0xff]  ;;  %vm1147_vm14 = vcmp.lt.s32.totalorder %v1146_v32, %v1591_v1  ;;  %s926_s22 = sshra.s32 %s1226_s2, 3  ;;  %s1158_s24 = scalar_lea.vmem [#allocation16], %s1226_s2 }
 0x2a3   : > { %1059 = vmatpush.msra.mxu3 %v998_v37  ;;  %v987_v39 = vld [vmem:[#allocation15 + $0x1a0] sm:$0xff]  ;;  %v988_v47 = vld [vmem:[#allocation15 + $0x1a8] sm:$0xff]  ;;  %v990_v48 = vld [vmem:[#allocation15 + $0x1b8] sm:$0xff]  ;;  %v1148_v36 = vsel %vm1147_vm14, 1, %v1503_v44  ;;  %1281 = vset.pattern.permute.xlu0 %v1503_v44  ;;  %s1233_s5 = sshll.u32 %s926_s22, 5  ;;  %p919_p1 = scmp.ge.s32.totalorder %s922_s7, 8  }
 0x2a4   : > { %1000 = vmatpush.msra.mxu0 %v991_v45  ;;  %1020 = vmatpush.msra.mxu1 %v992_v46  ;;  %v983_v49 = vld [vmem:[#allocation15 + $0x180] sm:$0xff]  ;;  %v984_v50 = vld [vmem:[#allocation15 + $0x188] sm:$0xff]  ;;  %v986_v51 = vld [vmem:[#allocation15 + $0x198] sm:$0xff]  ;;  %s930_s23 = scalar_lea.vmem [#allocation2], %s1233_s5  ;;  %s1169_s1 = sshll.u32 (%p919_p1), %s1751_s8, 4  ;;  %s1170_s1 = int_to_ptr.hbm [resolvable:$true] %s1169_s1 }
 0x2a5   : > { %1060 = vmatpush.msra.mxu3 %v994_v38  ;;  %v979_v52 = vld [vmem:[#allocation15 + $0x160] sm:$0xff]  ;;  %v980_v53 = vld [vmem:[#allocation15 + $0x168] sm:$0xff]  ;;  %v982_v54 = vld [vmem:[#allocation15 + $0x178] sm:$0xff]  ;;  %1150 = vperm.xlu0 %1281, %v1148_v36   ;;  %s1504_s29 = smov (%p919_p1), [#allocation16]   ;;  %s1505_s10 = smov (%p919_p1), [#allocation17]  }
 0x2a6   : > { %1001 = vmatpush.msra.mxu0 %v987_v39  ;;  %1021 = vmatpush.msra.mxu1 %v988_v47  ;;  %v975_v55 = vld [vmem:[#allocation15 + $0x140] sm:$0xff]  ;;  %v976_v56 = vld [vmem:[#allocation15 + $0x148] sm:$0xff]  ;;  %v997_v57 = vld [vmem:[#allocation15 + $0x1f0] sm:$0xff]  ;;  %s1167_s30 = sshll.u32 (%p919_p1), %s1504_s29, 4  ;;  %s1180_s11 = sshll.u32 (%p919_p1), %s1505_s10, 4  ;;  %s1168_s30 = int_to_ptr.vmem [resolvable:$true] %s1167_s30  ;;  %s1181_s11 = int_to_ptr.vmem [resolvable:$true] %s1180_s11 }
 0x2a7   : > { %1061 = vmatpush.msra.mxu3 %v990_v48  ;;  %v978_v58 = vld [vmem:[#allocation15 + $0x158] sm:$0xff]  ;;  %v993_v59 = vld [vmem:[#allocation15 + $0x1d0] sm:$0xff]  ;;  %v971_v60 = vld [vmem:[#allocation15 + $0x120] sm:$0xff]  ;;  %1039 = vmatpush.msra.mxu2 %v997_v57  ;;  %s1182_s6 = sshll.u32 (%p919_p1), %s1752_s9, 4  ;;  %s1183_s6 = int_to_ptr.hbm [resolvable:$true] %s1182_s6 }
 0x2a8   : > { %1002 = vmatpush.msra.mxu0 %v983_v49  ;;  %1022 = vmatpush.msra.mxu1 %v984_v50  ;;  %v972_v61 = vld [vmem:[#allocation15 + $0x128] sm:$0xff]  ;;  %v974_v62 = vld [vmem:[#allocation15 + $0x138] sm:$0xff]  ;;  %v989_v63 = vld [vmem:[#allocation15 + $0x1b0] sm:$0xff] }
 0x2a9   : > { %1062 = vmatpush.msra.mxu3 %v986_v51  ;;  %v967_v2 = vld [vmem:[#allocation15 + $0x100] sm:$0xff]  ;;  %v968_v3 = vld [vmem:[#allocation15 + $0x108] sm:$0xff]  ;;  %1040 = vmatpush.msra.mxu2 %v993_v59  ;;  %v970_v4 = vld [vmem:[#allocation15 + $0x118] sm:$0xff] }
 0x2aa   : > { %1003 = vmatpush.msra.mxu0 %v979_v52  ;;  %1023 = vmatpush.msra.mxu1 %v980_v53  ;;  %v985_v5 = vld [vmem:[#allocation15 + $0x190] sm:$0xff]  ;;  %v963_v6 = vld [vmem:[#allocation15 + $0xe0] sm:$0xff]  ;;  %v964_v7 = vld [vmem:[#allocation15 + $0xe8] sm:$0xff] }
 0x2ab   : > { %1063 = vmatpush.msra.mxu3 %v982_v54  ;;  %1041 = vmatpush.msra.mxu2 %v989_v63  ;;  %v966_v8 = vld [vmem:[#allocation15 + $0xf8] sm:$0xff]  ;;  %v981_v9 = vld [vmem:[#allocation15 + $0x170] sm:$0xff]  ;;  %v959_v10 = vld [vmem:[#allocation15 + $0xc0] sm:$0xff] }
 0x2ac   : > { %1004 = vmatpush.msra.mxu0 %v975_v55  ;;  %1024 = vmatpush.msra.mxu1 %v976_v56  ;;  %v960_v11 = vld [vmem:[#allocation15 + $0xc8] sm:$0xff]  ;;  %v962_v12 = vld [vmem:[#allocation15 + $0xd8] sm:$0xff]  ;;  %v977_v17 = vld [vmem:[#allocation15 + $0x150] sm:$0xff] }
 0x2ad   : > { %1064 = vmatpush.msra.mxu3 %v978_v58  ;;  %1042 = vmatpush.msra.mxu2 %v985_v5  ;;  %v955_v18 = vld [vmem:[#allocation15 + $0xa0] sm:$0xff]  ;;  %v956_v19 = vld [vmem:[#allocation15 + $0xa8] sm:$0xff]  ;;  %v958_v20 = vld [vmem:[#allocation15 + $0xb8] sm:$0xff] }
 0x2ae   : > { %1005 = vmatpush.msra.mxu0 %v971_v60  ;;  %1025 = vmatpush.msra.mxu1 %v972_v61  ;;  %v973_v22 = vld [vmem:[#allocation15 + $0x130] sm:$0xff]  ;;  %v951_v13 = vld [vmem:[#allocation15 + $0x80] sm:$0xff]  ;;  %v952_v23 = vld [vmem:[#allocation15 + $0x88] sm:$0xff] }
 0x2af   : > { %1065 = vmatpush.msra.mxu3 %v974_v62  ;;  %1043 = vmatpush.msra.mxu2 %v981_v9  ;;  %v954_v14 = vld [vmem:[#allocation15 + $0x98] sm:$0xff]  ;;  %v969_v24 = vld [vmem:[#allocation15 + $0x110] sm:$0xff]  ;;  %v947_v25 = vld [vmem:[#allocation15 + $0x60] sm:$0xff] }
 0x2b0   : > { %1006 = vmatpush.msra.mxu0 %v967_v2  ;;  %1026 = vmatpush.msra.mxu1 %v968_v3  ;;  %v948_v15 = vld [vmem:[#allocation15 + $0x68] sm:$0xff]  ;;  %v950_v16 = vld [vmem:[#allocation15 + $0x78] sm:$0xff]  ;;  %v965_v26 = vld [vmem:[#allocation15 + $0xf0] sm:$0xff] }
 0x2b1   : > { %1066 = vmatpush.msra.mxu3 %v970_v4  ;;  %1044 = vmatpush.msra.mxu2 %v977_v17  ;;  %v943_v27 = vld [vmem:[#allocation15 + $0x40] sm:$0xff]  ;;  %v944_v28 = vld [vmem:[#allocation15 + $0x48] sm:$0xff]  ;;  %v946_v21 = vld [vmem:[#allocation15 + $0x58] sm:$0xff] }
 0x2b2   : > { %1007 = vmatpush.msra.mxu0 %v963_v6  ;;  %1027 = vmatpush.msra.mxu1 %v964_v7  ;;  %v961_v29 = vld [vmem:[#allocation15 + $0xd0] sm:$0xff]  ;;  %v939_v30 = vld [vmem:[#allocation15 + $0x20] sm:$0xff]  ;;  %v940_v31 = vld [vmem:[#allocation15 + $0x28] sm:$0xff] }
 0x2b3   : > { %1067 = vmatpush.msra.mxu3 %v966_v8  ;;  %1045 = vmatpush.msra.mxu2 %v973_v22  ;;  %v942_v33 = vld [vmem:[#allocation15 + $0x38] sm:$0xff]  ;;  %v957_v34 = vld [vmem:[#allocation15 + $0xb0] sm:$0xff]  ;;  %v935_v35 = vld [vmem:[#allocation15] sm:$0xff] }
 0x2b4   : > { %1008 = vmatpush.msra.mxu0 %v959_v10  ;;  %1028 = vmatpush.msra.mxu1 %v960_v11  ;;  %v936_v40 = vld [vmem:[#allocation15 + $0x8] sm:$0xff]  ;;  %v938_v41 = vld [vmem:[#allocation15 + $0x18] sm:$0xff]  ;;  %v1712_v42 = vld [vmem:[#allocation5] sm:$0xff] }
 0x2b5   : > { %1068 = vmatpush.msra.mxu3 %v962_v12  ;;  %1046 = vmatpush.msra.mxu2 %v969_v24  ;;  %v953_v43 = vld [vmem:[#allocation15 + $0x90] sm:$0xff]  ;;  %v932_v39 = vld [vmem:[%s930_s23 + $0x8] sm:$0xff]  ;;  %v934_v53 = vld [vmem:[%s930_s23 + $0x18] sm:$0xff] }
 0x2b6   : > { %1009 = vmatpush.msra.mxu0 %v955_v18  ;;  %1029 = vmatpush.msra.mxu1 %v956_v19  ;;  %v949_v0 = vld [vmem:[#allocation15 + $0x70] sm:$0xff]  ;;  %v933_v61 = vld [vmem:[%s930_s23 + $0x10] sm:$0xff] }
 0x2b7   : > { %1069 = vmatpush.msra.mxu3 %v958_v20  ;;  %1047 = vmatpush.msra.mxu2 %v965_v26  ;;  %v945_v37 = vld [vmem:[#allocation15 + $0x50] sm:$0xff] }
 0x2b8   : > { %1010 = vmatpush.msra.mxu0 %v951_v13  ;;  %1030 = vmatpush.msra.mxu1 %v952_v23  ;;  %v941_v45 = vld [vmem:[#allocation15 + $0x30] sm:$0xff] }
 0x2b9   : > { %1070 = vmatpush.msra.mxu3 %v954_v14  ;;  %1048 = vmatpush.msra.mxu2 %v961_v29  ;;  %v937_v46 = vld [vmem:[#allocation15 + $0x10] sm:$0xff] }
 0x2ba   : > { %1011 = vmatpush.msra.mxu0 %v947_v25  ;;  %1031 = vmatpush.msra.mxu1 %v948_v15  ;;  %v931_v38 = vld [vmem:[%s930_s23] sm:$0xff]  ;;  %v925_v15 = vld [vmem:[#allocation6] sm:$0xff] }
 0x2bb   : > { %1071 = vmatpush.msra.mxu3 %v950_v16  ;;  %1049 = vmatpush.msra.mxu2 %v957_v34 }
 0x2bc   : > { %1012 = vmatpush.msra.mxu0 %v943_v27  ;;  %1032 = vmatpush.msra.mxu1 %v944_v28 }
 0x2bd   : > { %1072 = vmatpush.msra.mxu3 %v946_v21  ;;  %1050 = vmatpush.msra.mxu2 %v953_v43 }
 0x2be   : > { %1013 = vmatpush.msra.mxu0 %v939_v30  ;;  %1033 = vmatpush.msra.mxu1 %v940_v31 }
 0x2bf   : > { %1073 = vmatpush.msra.mxu3 %v942_v33  ;;  %1051 = vmatpush.msra.mxu2 %v949_v0 }
 0x2c0   : > { %1014 = vmatpush.msra.mxu0 %v935_v35  ;;  %1034 = vmatpush.msra.mxu1 %v936_v40 }
 0x2c1   : > { %1074 = vmatpush.msra.mxu3 %v938_v41  ;;  %1015 = vmatmul.f32.vlgmr.msra.gmra.mxu0 %v1712_v42 }
 0x2c2   : > { %1035 = vmatmul.f32.vlgmr.msra.gmra.mxu1 %v1712_v42  ;;  %1075 = vmatmul.f32.vlgmr.msra.gmra.mxu3 %v1712_v42 }
 0x2c3   : > { %1052 = vmatpush.msra.mxu2 %v945_v37 }
 0x2c5   : > { %1053 = vmatpush.msra.mxu2 %v941_v45 }
 0x2c7   : > { %1054 = vmatpush.msra.mxu2 %v937_v46 }
 0x2c8   : > { %1055 = vmatmul.f32.vlgmr.msra.gmra.mxu2 %v1712_v42 }
 0x317   : > { %v1151_v27 = vpop.permute.xlu0 %1150 }
 0x318   : > { %vm1152_vm7 = vcmp.eq.s32.totalorder %v1151_v27, 1 }
 0x33e   : > { %v1016_v47 = vpop.f32.mrf.mxu0 }
 0x33f   : > { %v1079_v48 = vadd.f32 %v1016_v47, %v931_v38  ;;  %v1036_v49 = vpop.f32.mrf.mxu1 }
 0x340   : > { %v1080_v50 = vadd.f32 %v1036_v49, %v932_v39 }
 0x341   : > { %v1229_v51 = vmul.f32 -1.442695, %v1079_v48 }
 0x342   : > { %v1230_v52 = vmul.f32 -1.442695, %v1080_v50 }
 0x343   : > { %1282 = vpow2.f32 %v1229_v51 }
 0x344   : > { %1284 = vpow2.f32 %v1230_v52 }
 0x345   : > { %v1076_v54 = vpop.f32.mrf.mxu3 }
 0x346   : > { %v1082_v55 = vadd.f32 %v1076_v54, %v934_v53 }
 0x348   : > { %v1231_v56 = vmul.f32 -1.442695, %v1082_v55 }
 0x349   : > { %v1283_v57 = vpop.eup %1282 }
 0x34a   : > { %v1285_v58 = vpop.eup %1284  ;;  %v1086_v59 = vadd.f32 1.0, %v1283_v57  ;;  %1286 = vpow2.f32 %v1231_v56 }
 0x34b   : > { %v1105_v60 = vadd.f32 1.0, %v1285_v58  ;;  %v1056_v62 = vpop.f32.mrf.mxu2 }
 0x34c   : > { %1288 = vrcp.f32 %v1086_v59  ;;  %v1081_v2 = vadd.f32 %v1056_v62, %v933_v61  ;;  %v1098_v10 = vand.u32 2147483648, %v1086_v59  ;;  %v1096_v12 = vand.u32 2147483647, %v1086_v59 }
 0x34d   : > { %1290 = vrcp.f32 %v1105_v60  ;;  %v1117_v17 = vand.u32 2147483648, %v1105_v60  ;;  %v1115_v19 = vand.u32 2147483647, %v1105_v60  ;;  %vm1092_vm1 = vweird.f32 %v1086_v59 }
 0x34e   : > { %v1099_v14 = vor.u32 1.1754944e-38, %v1098_v10  ;;  %vm1111_vm3 = vweird.f32 %v1105_v60  ;;  %vm1097_vm4 = vcmp.eq.f32.partialorder %v1096_v12, 8.507059e+37 }
 0x34f   : > { %v1118_v16 = vor.u32 1.1754944e-38, %v1117_v17  ;;  %vm1116_vm6 = vcmp.eq.f32.partialorder %v1115_v19, 8.507059e+37 }
 0x350   : > { %v1287_v63 = vpop.eup %1286 }
 0x351   : > { %v1125_v3 = vadd.f32 1.0, %v1287_v63 }
 0x352   : > { %v1289_v4 = vpop.eup %1288 }
 0x353   : > { %v1291_v5 = vpop.eup %1290  ;;  %v1088_v6 = vmul.f32 %v1289_v4, %v1086_v59  ;;  %1292 = vrcp.f32 %v1125_v3  ;;  %vm1093_vm15 = vweird.f32 %v1289_v4  ;;  %v1137_v35 = vand.u32 2147483648, %v1125_v3 }
 0x354   : > { %v1107_v7 = vmul.f32 %v1291_v5, %v1105_v60  ;;  %1294 = vtanh.f32 %v1081_v2  ;;  %vm1112_vm0 = vweird.f32 %v1291_v5  ;;  %vm1094_vm2 = vmor %vm1092_vm1, %vm1093_vm15  ;;  %vm1131_vm9 = vweird.f32 %v1125_v3 }
 0x355   : > { %v1089_v8 = vsub.f32 1.0, %v1088_v6  ;;  %vm1113_vm5 = vmor %vm1111_vm3, %vm1112_vm0  ;;  %v1135_v41 = vand.u32 2147483647, %v1125_v3  ;;  %v1138_v44 = vor.u32 1.1754944e-38, %v1137_v35 }
 0x356   : > { %v1108_v9 = vsub.f32 1.0, %v1107_v7 }
 0x357   : > { %v1090_v11 = vmul.f32 %v1289_v4, %v1089_v8  ;;  %vm1136_vm11 = vcmp.eq.f32.partialorder %v1135_v41, 8.507059e+37 }
 0x358   : > { %v1109_v18 = vmul.f32 %v1291_v5, %v1108_v9 }
 0x359   : > { %v1293_v20 = vpop.eup %1292  ;;  %v1091_v22 = vadd.f32 %v1289_v4, %v1090_v11 }
 0x35a   : > { %v1295_v13 = vpop.eup %1294  ;;  %v1127_v23 = vmul.f32 %v1293_v20, %v1125_v3  ;;  %v1110_v24 = vadd.f32 %v1291_v5, %v1109_v18  ;;  %vm1132_vm8 = vweird.f32 %v1293_v20 }
 0x35b   : > { %v1095_v25 = vsel %vm1094_vm2, %v1289_v4, %v1091_v22  ;;  %vm1133_vm10 = vmor %vm1131_vm9, %vm1132_vm8 }
 0x35c   : > { %v1100_v26 = vsel %vm1097_vm4, %v1099_v14, %v1095_v25  ;;  %v1114_v28 = vsel %vm1113_vm5, %v1291_v5, %v1110_v24  ;;  %v1128_v21 = vsub.f32 1.0, %v1127_v23 }
 0x35d   : > { %v1142_v29 = vmul.f32 %v1295_v13, %v1100_v26  ;;  %v1119_v30 = vsel %vm1116_vm6, %v1118_v16, %v1114_v28 }
 0x35e   : > { %v1129_v31 = vmul.f32 %v1293_v20, %v1128_v21  ;;  %v1141_v32 = vmul.f32 %v1119_v30, %v925_v15 }
 0x360   : > { %v1143_v33 = vadd.f32 %v1142_v29, %v1141_v32  ;;  %v1130_v34 = vadd.f32 %v1293_v20, %v1129_v31 }
 0x362   : > { %1296 = vtanh.f32 %v1143_v33  ;;  %v1155_v40 = vsel %vm1152_vm7, %v1143_v33, %v925_v15  ;;  %v1134_v43 = vsel %vm1133_vm10, %v1293_v20, %v1130_v34 }
 0x363   : > { %1156 = vst [vmem:[#allocation6] sm:$0xff] %v1155_v40  ;;  %v1139_v0 = vsel %vm1136_vm11, %v1138_v44, %v1134_v43 }
 0x368   : > { %v1297_v36 = vpop.eup %1296 }
 0x369   : > { %v1145_v37 = vmul.f32 %v1297_v36, %v1139_v0  ;;  %921 = sbr.rel (!%p919_p1) target bundleno = 673 (0x2a1), region = 110 }
 0x36b   : > { %v1153_v45 = vsel %vm1152_vm7, %v1145_v37, %v1712_v42  ;;  %v1157_v46 = vsel %vm1152_vm7, %v1145_v37, 0.0 }
 0x36c   : > { %1154 = vst [vmem:[#allocation5] sm:$0xff] %v1153_v45 }
 0x36d   : > { %1159 = vst [vmem:[%s1158_s24] sm:$0xff] %v1157_v46 }
 0x36e   :  { %1175 = dma.vmem_to_hbm [thread:$0]  %s1168_s30, 1024, %s1170_s1, [#allocation9], %s1497_s27, %s1497_s27, %s1498_s28  }
 0x373   :  { %v1160_v38 = vld [vmem:[#allocation5] sm:$0xff] }
 0x374   :  { %1162 = vst [vmem:[#allocation17 + $0x8] sm:$0xff] %v1160_v38 }
 0x375   :  { %1188 = dma.vmem_to_hbm [thread:$0]  %s1181_s11, 256, %s1183_s6, [#allocation18], %s1497_s27, %s1497_s27, %s1498_s28  }
 0x376   :  { %1480 = dma.done.wait [#allocation9], 1024  }
 0x377   :  { %1481 = vsyncadd [#allocation9], 4294966272 }
 0x378   :  { %1482 = dma.done.wait [#allocation18], 256  }
 0x379   :  { %1483 = vsyncadd [#allocation18], 4294967040 }
 0x37a   :  { %1197 = vsyncpa [#allocation8], 1 }
 0x37b   :  { %1198 = vsyncpa [#allocation11], 1 }
 0x37c   :  { %1199 = vsyncpa [#allocation14], 1 }
 0x37d   :  { %1200 = vsyncpa [#allocation9], 1 }
 0x37e   :  { %1201 = vsyncpa [#allocation18], 1 }

</bundles_post_ra>
